<compile_context>
chip_gen: v5e
topology: v5e:2x2
jax: 0.10.0
libtpu: 0.0.40
codegen_flags: <defaults>
</compile_context>

<pallas_src>
import functools
import math

import jax
import jax.numpy as jnp
from jax.experimental import pallas as pl
from jax.experimental.pallas import tpu as pltpu

# ---------------- small synthetic BERT configuration ----------------
VOCAB = 64
SEQ = 8            # padded sequence length
HID = 32           # bert hidden_size (scaled down from 768)
N_HEADS = 4
HEAD_DIM = HID // N_HEADS
INTER = 64         # FFN intermediate size
N_LAYERS = 2
OUT_DIM = 256      # TextEncoder.linear output_dim (module default)
LN_EPS = 1e-12


# ---------------- fused encoder kernel ----------------
def _encoder_kernel(h0_ref, bias_ref, emb_g_ref, emb_b_ref,
                    wqkv_ref, bqkv_ref, wo_ref, bo_ref,
                    ln1_g_ref, ln1_b_ref, wi_ref, bi_ref,
                    wf_ref, bf_ref, ln2_g_ref, ln2_b_ref,
                    wp_ref, bp_ref, o_ref, *, batch, seq):
    n_tok = batch * seq
    scale = 1.0 / math.sqrt(HEAD_DIM)

    def ln(x, g, b):
        x = x.astype(jnp.float32)
        mu = jnp.mean(x, axis=-1, keepdims=True)
        var = jnp.mean(jnp.square(x - mu), axis=-1, keepdims=True)
        return (x - mu) * jax.lax.rsqrt(var + LN_EPS) * g + b

    # additive attention bias over flattened tokens:
    # block-diagonal (cross-batch = -1e9) + per-key padding mask, hoisted once.
    bias = bias_ref[...]                                    # (n_tok, n_tok)

    # BERT embeddings LayerNorm (the table gather itself is JAX-side glue).
    h = ln(h0_ref[...], emb_g_ref[...], emb_b_ref[...])     # (n_tok, HID)

    for l in range(N_LAYERS):
        # ---- self-attention: fused QKV projection, all heads in-register ----
        qkv = (jnp.dot(h, wqkv_ref[l], preferred_element_type=jnp.float32)
               + bqkv_ref[l])                               # (n_tok, 3*HID)
        wo_l = wo_ref[l]                                    # (HID, HID)

        attn = jnp.zeros((n_tok, HID), jnp.float32)
        for hh in range(N_HEADS):                           # unrolled, static
            lo = hh * HEAD_DIM
            qh = qkv[:, lo:lo + HEAD_DIM]                   # (n_tok, hd)
            kh = qkv[:, HID + lo:HID + lo + HEAD_DIM]
            vh = qkv[:, 2 * HID + lo:2 * HID + lo + HEAD_DIM]

            s = jax.lax.dot_general(qh, kh, (((1,), (1,)), ((), ())),
                                    preferred_element_type=jnp.float32)
            s = s * scale + bias                            # (n_tok, n_tok)
            m = jnp.max(s, axis=-1, keepdims=True)
            p = jnp.exp(s - m)
            p = p * pl.reciprocal(jnp.sum(p, axis=-1, keepdims=True),
                                  approx=True)
            ctx_h = jnp.dot(p, vh, preferred_element_type=jnp.float32)
            # fold the output projection in per-head: ctx @ Wo == sum_h ctx_h @ Wo[h]
            attn = attn + jnp.dot(ctx_h, wo_l[lo:lo + HEAD_DIM, :],
                                  preferred_element_type=jnp.float32)
        attn = attn + bo_ref[l]

        h = ln(attn + h, ln1_g_ref[l], ln1_b_ref[l])

        # ---- feed-forward ----
        inter = jax.nn.gelu(
            jnp.dot(h, wi_ref[l], preferred_element_type=jnp.float32)
            + bi_ref[l], approximate=True)                  # (n_tok, INTER)
        ffn = (jnp.dot(inter, wf_ref[l], preferred_element_type=jnp.float32)
               + bf_ref[l])
        h = ln(ffn + h, ln2_g_ref[l], ln2_b_ref[l])

    # ---- CLS token selection (row b*seq per batch) via a tiny selection matmul
    # (avoids sub-sublane slicing/concat), then the final Linear. ----
    sel_row = jax.lax.broadcasted_iota(jnp.int32, (batch, n_tok), 0)
    sel_col = jax.lax.broadcasted_iota(jnp.int32, (batch, n_tok), 1)
    sel = (sel_col == sel_row * seq).astype(jnp.float32)    # (batch, n_tok)
    cls = jnp.dot(sel, h, preferred_element_type=jnp.float32)          # (batch, HID)
    o_ref[...] = (jnp.dot(cls, wp_ref[...], preferred_element_type=jnp.float32)
                  + bp_ref[...]).astype(o_ref.dtype)


# ---------------- parameters ----------------
def init_params(key):
    keys = jax.random.split(key, 8)
    nrm = lambda k, shape: 0.02 * jax.random.normal(k, shape, jnp.float32)
    L = N_LAYERS
    return {
        "word_emb": nrm(keys[0], (VOCAB, HID)),
        "pos_emb": nrm(keys[1], (SEQ, HID)),
        "type_emb": nrm(keys[2], (2, HID)),
        "emb_ln_g": jnp.ones((1, HID), jnp.float32),
        "emb_ln_b": jnp.zeros((1, HID), jnp.float32),
        # fused QKV weights: (L, HID, 3*HID)
        "wqkv": nrm(keys[3], (L, HID, 3 * HID)),
        "bqkv": jnp.zeros((L, 1, 3 * HID), jnp.float32),
        "wo": nrm(keys[4], (L, HID, HID)),
        "bo": jnp.zeros((L, 1, HID), jnp.float32),
        "ln1_g": jnp.ones((L, 1, HID), jnp.float32),
        "ln1_b": jnp.zeros((L, 1, HID), jnp.float32),
        "wi": nrm(keys[5], (L, HID, INTER)),
        "bi": jnp.zeros((L, 1, INTER), jnp.float32),
        "wf": nrm(keys[6], (L, INTER, HID)),
        "bf": jnp.zeros((L, 1, HID), jnp.float32),
        "ln2_g": jnp.ones((L, 1, HID), jnp.float32),
        "ln2_b": jnp.zeros((L, 1, HID), jnp.float32),
        "w_proj": nrm(keys[7], (HID, OUT_DIM)),
        "b_proj": jnp.zeros((1, OUT_DIM), jnp.float32),
    }


# ---------------- forward ----------------
def text_encoder_forward(params, input_ids, attention_mask):
    # TODO(synk): AutoTokenizer (string -> token ids) has no Pallas equivalent;
    # this forward consumes already-tokenized input_ids / attention_mask.
    B, S = input_ids.shape
    n_tok = B * S

    # BERT embedding table gathers stay in JAX (glue); everything else is one kernel.
    h0 = (params["word_emb"][input_ids]
          + params["pos_emb"][:S][None, :, :]
          + params["type_emb"][0][None, None, :]
          ).reshape(n_tok, HID).astype(jnp.float32)

    # Combined additive attention bias over the flattened token axis:
    # cross-batch pairs get -1e9 (block-diagonal attention), padded keys get -1e9.
    # Tiny (n_tok, n_tok) array — replaces the old redundant (B, S, S) broadcast.
    neg_row = ((1.0 - attention_mask.astype(jnp.float32)) * -1e9).reshape(1, n_tok)
    tok_batch = jnp.repeat(jnp.arange(B, dtype=jnp.int32), S)
    cross = jnp.where(tok_batch[:, None] == tok_batch[None, :],
                      0.0, -1e9).astype(jnp.float32)
    attn_bias = cross + neg_row                                       # (n_tok, n_tok)

    args = (h0, attn_bias, params["emb_ln_g"], params["emb_ln_b"],
            params["wqkv"], params["bqkv"], params["wo"], params["bo"],
            params["ln1_g"], params["ln1_b"], params["wi"], params["bi"],
            params["wf"], params["bf"], params["ln2_g"], params["ln2_b"],
            params["w_proj"], params["b_proj"])

    def full_spec(a):
        nd = a.ndim
        return pl.BlockSpec(a.shape, lambda i, _nd=nd: (0,) * _nd)

    return pl.pallas_call(
        functools.partial(_encoder_kernel, batch=B, seq=S),
        out_shape=jax.ShapeDtypeStruct((B, OUT_DIM), jnp.float32),
        grid=(1,),
        in_specs=[full_spec(a) for a in args],
        out_specs=pl.BlockSpec((B, OUT_DIM), lambda i: (0, 0)),
        compiler_params=pltpu.CompilerParams(
            dimension_semantics=("arbitrary",)),
    )(*args)


if __name__ == "__main__":
    key = jax.random.PRNGKey(0)
    pkey, ikey = jax.random.split(key)
    params = init_params(pkey)

    B = 2
    input_ids = jax.random.randint(ikey, (B, SEQ), 0, VOCAB, dtype=jnp.int32)
    attention_mask = jnp.array(
        [[1, 1, 1, 1, 1, 1, 1, 1],
         [1, 1, 1, 1, 1, 0, 0, 0]], dtype=jnp.int32)

    features = text_encoder_forward(params, input_ids, attention_mask)
    features = jax.block_until_ready(features)

    assert features.shape == (B, OUT_DIM), features.shape
    assert features.dtype == jnp.float32
    assert bool(jnp.all(jnp.isfinite(features)))
    print("KERNEL_OK")
</pallas_src>

<mosaic_0001>
module attributes {stable_mosaic.version = 11 : i64} {
  func.func @_encoder_kernel(%arg0: i32, %arg1: memref<16x32xf32, #tpu.memory_space<vmem>>, %arg2: memref<16x16xf32, #tpu.memory_space<vmem>>, %arg3: memref<1x32xf32, #tpu.memory_space<vmem>>, %arg4: memref<1x32xf32, #tpu.memory_space<vmem>>, %arg5: memref<2x32x96xf32, #tpu.memory_space<vmem>>, %arg6: memref<2x1x96xf32, #tpu.memory_space<vmem>>, %arg7: memref<2x32x32xf32, #tpu.memory_space<vmem>>, %arg8: memref<2x1x32xf32, #tpu.memory_space<vmem>>, %arg9: memref<2x1x32xf32, #tpu.memory_space<vmem>>, %arg10: memref<2x1x32xf32, #tpu.memory_space<vmem>>, %arg11: memref<2x32x64xf32, #tpu.memory_space<vmem>>, %arg12: memref<2x1x64xf32, #tpu.memory_space<vmem>>, %arg13: memref<2x64x32xf32, #tpu.memory_space<vmem>>, %arg14: memref<2x1x32xf32, #tpu.memory_space<vmem>>, %arg15: memref<2x1x32xf32, #tpu.memory_space<vmem>>, %arg16: memref<2x1x32xf32, #tpu.memory_space<vmem>>, %arg17: memref<32x256xf32, #tpu.memory_space<vmem>>, %arg18: memref<1x256xf32, #tpu.memory_space<vmem>>, %arg19: memref<2x256xf32, #tpu.memory_space<vmem>>) attributes {dimension_semantics = [#tpu.dimension_semantics<arbitrary>], iteration_bounds = array<i64: 1>, scalar_prefetch = 0 : i64, scratch_operands = 0 : i64, tpu.core_type = #tpu.core_type<tc>, window_params = [{pipeline_mode = #tpu.pipeline_mode<synchronous>, transform_indices = @transform_0, window_bounds = array<i64: 16, 32>}, {pipeline_mode = #tpu.pipeline_mode<synchronous>, transform_indices = @transform_1, window_bounds = array<i64: 16, 16>}, {pipeline_mode = #tpu.pipeline_mode<synchronous>, transform_indices = @transform_2, window_bounds = array<i64: 1, 32>}, {pipeline_mode = #tpu.pipeline_mode<synchronous>, transform_indices = @transform_3, window_bounds = array<i64: 1, 32>}, {pipeline_mode = #tpu.pipeline_mode<synchronous>, transform_indices = @transform_4, window_bounds = array<i64: 2, 32, 96>}, {pipeline_mode = #tpu.pipeline_mode<synchronous>, transform_indices = @transform_5, window_bounds = array<i64: 2, 1, 96>}, {pipeline_mode = #tpu.pipeline_mode<synchronous>, transform_indices = @transform_6, window_bounds = array<i64: 2, 32, 32>}, {pipeline_mode = #tpu.pipeline_mode<synchronous>, transform_indices = @transform_7, window_bounds = array<i64: 2, 1, 32>}, {pipeline_mode = #tpu.pipeline_mode<synchronous>, transform_indices = @transform_8, window_bounds = array<i64: 2, 1, 32>}, {pipeline_mode = #tpu.pipeline_mode<synchronous>, transform_indices = @transform_9, window_bounds = array<i64: 2, 1, 32>}, {pipeline_mode = #tpu.pipeline_mode<synchronous>, transform_indices = @transform_10, window_bounds = array<i64: 2, 32, 64>}, {pipeline_mode = #tpu.pipeline_mode<synchronous>, transform_indices = @transform_11, window_bounds = array<i64: 2, 1, 64>}, {pipeline_mode = #tpu.pipeline_mode<synchronous>, transform_indices = @transform_12, window_bounds = array<i64: 2, 64, 32>}, {pipeline_mode = #tpu.pipeline_mode<synchronous>, transform_indices = @transform_13, window_bounds = array<i64: 2, 1, 32>}, {pipeline_mode = #tpu.pipeline_mode<synchronous>, transform_indices = @transform_14, window_bounds = array<i64: 2, 1, 32>}, {pipeline_mode = #tpu.pipeline_mode<synchronous>, transform_indices = @transform_15, window_bounds = array<i64: 2, 1, 32>}, {pipeline_mode = #tpu.pipeline_mode<synchronous>, transform_indices = @transform_16, window_bounds = array<i64: 32, 256>}, {pipeline_mode = #tpu.pipeline_mode<synchronous>, transform_indices = @transform_17, window_bounds = array<i64: 1, 256>}, {pipeline_mode = #tpu.pipeline_mode<synchronous>, transform_indices = @transform_18, window_bounds = array<i64: 2, 256>}]} {
    %c0 = arith.constant 0 : index
    %c0_0 = arith.constant 0 : index
    %0 = vector.load %arg2[%c0, %c0_0] : memref<16x16xf32, #tpu.memory_space<vmem>>, vector<16x16xf32>
    %c0_1 = arith.constant 0 : index
    %c0_2 = arith.constant 0 : index
    %1 = vector.load %arg1[%c0_1, %c0_2] : memref<16x32xf32, #tpu.memory_space<vmem>>, vector<16x32xf32>
    %c0_3 = arith.constant 0 : index
    %c0_4 = arith.constant 0 : index
    %2 = vector.load %arg3[%c0_3, %c0_4] : memref<1x32xf32, #tpu.memory_space<vmem>>, vector<1x32xf32>
    %c0_5 = arith.constant 0 : index
    %c0_6 = arith.constant 0 : index
    %3 = vector.load %arg4[%c0_5, %c0_6] : memref<1x32xf32, #tpu.memory_space<vmem>>, vector<1x32xf32>
    %cst = arith.constant dense<0.000000e+00> : vector<16xf32>
    %4 = vector.multi_reduction <add>, %1, %cst [1] : vector<16x32xf32> to vector<16xf32>
    %5 = vector.shape_cast %4 : vector<16xf32> to vector<16x1xf32>
    %cst_7 = arith.constant 3.200000e+01 : f32
    %6 = vector.broadcast %cst_7 : f32 to vector<16x1xf32>
    %7 = arith.divf %5, %6 : vector<16x1xf32>
    %8 = vector.broadcast %7 : vector<16x1xf32> to vector<16x32xf32>
    %9 = arith.subf %1, %8 : vector<16x32xf32>
    %10 = arith.mulf %9, %9 : vector<16x32xf32>
    %cst_8 = arith.constant dense<0.000000e+00> : vector<16xf32>
    %11 = vector.multi_reduction <add>, %10, %cst_8 [1] : vector<16x32xf32> to vector<16xf32>
    %12 = vector.shape_cast %11 : vector<16xf32> to vector<16x1xf32>
    %cst_9 = arith.constant 3.200000e+01 : f32
    %13 = vector.broadcast %cst_9 : f32 to vector<16x1xf32>
    %14 = arith.divf %12, %13 : vector<16x1xf32>
    %15 = vector.broadcast %7 : vector<16x1xf32> to vector<16x32xf32>
    %16 = arith.subf %1, %15 : vector<16x32xf32>
    %cst_10 = arith.constant 9.99999996E-13 : f32
    %17 = vector.broadcast %cst_10 : f32 to vector<16x1xf32>
    %18 = arith.addf %14, %17 : vector<16x1xf32>
    %19 = math.rsqrt %18 : vector<16x1xf32>
    %20 = vector.broadcast %19 : vector<16x1xf32> to vector<16x32xf32>
    %21 = arith.mulf %16, %20 : vector<16x32xf32>
    %22 = vector.broadcast %2 : vector<1x32xf32> to vector<16x32xf32>
    %23 = arith.mulf %21, %22 : vector<16x32xf32>
    %24 = vector.broadcast %3 : vector<1x32xf32> to vector<16x32xf32>
    %25 = arith.addf %23, %24 : vector<16x32xf32>
    %c0_11 = arith.constant 0 : index
    %c0_12 = arith.constant 0 : index
    %c0_13 = arith.constant 0 : index
    %26 = vector.load %arg5[%c0_11, %c0_12, %c0_13] : memref<2x32x96xf32, #tpu.memory_space<vmem>>, vector<1x32x96xf32>
    %27 = vector.shape_cast %26 : vector<1x32x96xf32> to vector<32x96xf32>
    %cst_14 = arith.constant dense<0.000000e+00> : vector<16x96xf32>
    %28 = tpu.matmul %25, %27, %cst_14 {dimension_numbers = #tpu.dot_dimension_numbers<[1], [0], [0], [1], [0, 0, 1, 1], [], []>} : vector<16x32xf32>, vector<32x96xf32>, vector<16x96xf32> -> vector<16x96xf32>
    %c0_15 = arith.constant 0 : index
    %c0_16 = arith.constant 0 : index
    %c0_17 = arith.constant 0 : index
    %29 = vector.load %arg6[%c0_15, %c0_16, %c0_17] : memref<2x1x96xf32, #tpu.memory_space<vmem>>, vector<1x1x96xf32>
    %30 = vector.shape_cast %29 : vector<1x1x96xf32> to vector<1x96xf32>
    %31 = vector.broadcast %30 : vector<1x96xf32> to vector<16x96xf32>
    %32 = arith.addf %28, %31 : vector<16x96xf32>
    %c0_18 = arith.constant 0 : index
    %c0_19 = arith.constant 0 : index
    %c0_20 = arith.constant 0 : index
    %33 = vector.load %arg7[%c0_18, %c0_19, %c0_20] : memref<2x32x32xf32, #tpu.memory_space<vmem>>, vector<1x32x32xf32>
    %34 = vector.shape_cast %33 : vector<1x32x32xf32> to vector<32x32xf32>
    %cst_21 = arith.constant 0.000000e+00 : f32
    %35 = vector.broadcast %cst_21 : f32 to vector<16x32xf32>
    %36 = vector.extract_strided_slice %32 {offsets = [0, 0], sizes = [16, 8], strides = [1, 1]} : vector<16x96xf32> to vector<16x8xf32>
    %37 = vector.extract_strided_slice %32 {offsets = [0, 32], sizes = [16, 8], strides = [1, 1]} : vector<16x96xf32> to vector<16x8xf32>
    %38 = vector.extract_strided_slice %32 {offsets = [0, 64], sizes = [16, 8], strides = [1, 1]} : vector<16x96xf32> to vector<16x8xf32>
    %cst_22 = arith.constant dense<0.000000e+00> : vector<16x16xf32>
    %39 = tpu.matmul %36, %37, %cst_22 {dimension_numbers = #tpu.dot_dimension_numbers<[1], [1], [0], [0], [0, 0, 1, 0], [], []>} : vector<16x8xf32>, vector<16x8xf32>, vector<16x16xf32> -> vector<16x16xf32>
    %cst_23 = arith.constant 0.353553385 : f32
    %40 = vector.broadcast %cst_23 : f32 to vector<16x16xf32>
    %41 = arith.mulf %39, %40 : vector<16x16xf32>
    %42 = arith.addf %41, %0 : vector<16x16xf32>
    %cst_24 = arith.constant dense<0xFF800000> : vector<16xf32>
    %43 = vector.multi_reduction <maximumf>, %42, %cst_24 [1] : vector<16x16xf32> to vector<16xf32>
    %44 = vector.shape_cast %43 : vector<16xf32> to vector<16x1xf32>
    %45 = vector.broadcast %44 : vector<16x1xf32> to vector<16x16xf32>
    %46 = arith.subf %42, %45 : vector<16x16xf32>
    %47 = math.exp %46 : vector<16x16xf32>
    %cst_25 = arith.constant dense<0.000000e+00> : vector<16xf32>
    %48 = vector.multi_reduction <add>, %47, %cst_25 [1] : vector<16x16xf32> to vector<16xf32>
    %49 = vector.shape_cast %48 : vector<16xf32> to vector<16x1xf32>
    %50 = tpu.reciprocal %49 {approx = true} : vector<16x1xf32> -> vector<16x1xf32>
    %51 = vector.broadcast %50 : vector<16x1xf32> to vector<16x16xf32>
    %52 = arith.mulf %47, %51 : vector<16x16xf32>
    %cst_26 = arith.constant dense<0.000000e+00> : vector<16x8xf32>
    %53 = tpu.matmul %52, %38, %cst_26 {dimension_numbers = #tpu.dot_dimension_numbers<[1], [0], [0], [1], [0, 0, 1, 1], [], []>} : vector<16x16xf32>, vector<16x8xf32>, vector<16x8xf32> -> vector<16x8xf32>
    %54 = vector.extract_strided_slice %34 {offsets = [0, 0], sizes = [8, 32], strides = [1, 1]} : vector<32x32xf32> to vector<8x32xf32>
    %cst_27 = arith.constant dense<0.000000e+00> : vector<16x32xf32>
    %55 = tpu.matmul %53, %54, %cst_27 {dimension_numbers = #tpu.dot_dimension_numbers<[1], [0], [0], [1], [0, 0, 1, 1], [], []>} : vector<16x8xf32>, vector<8x32xf32>, vector<16x32xf32> -> vector<16x32xf32>
    %56 = arith.addf %35, %55 : vector<16x32xf32>
    %57 = vector.extract_strided_slice %32 {offsets = [0, 8], sizes = [16, 8], strides = [1, 1]} : vector<16x96xf32> to vector<16x8xf32>
    %58 = vector.extract_strided_slice %32 {offsets = [0, 40], sizes = [16, 8], strides = [1, 1]} : vector<16x96xf32> to vector<16x8xf32>
    %59 = vector.extract_strided_slice %32 {offsets = [0, 72], sizes = [16, 8], strides = [1, 1]} : vector<16x96xf32> to vector<16x8xf32>
    %cst_28 = arith.constant dense<0.000000e+00> : vector<16x16xf32>
    %60 = tpu.matmul %57, %58, %cst_28 {dimension_numbers = #tpu.dot_dimension_numbers<[1], [1], [0], [0], [0, 0, 1, 0], [], []>} : vector<16x8xf32>, vector<16x8xf32>, vector<16x16xf32> -> vector<16x16xf32>
    %cst_29 = arith.constant 0.353553385 : f32
    %61 = vector.broadcast %cst_29 : f32 to vector<16x16xf32>
    %62 = arith.mulf %60, %61 : vector<16x16xf32>
    %63 = arith.addf %62, %0 : vector<16x16xf32>
    %cst_30 = arith.constant dense<0xFF800000> : vector<16xf32>
    %64 = vector.multi_reduction <maximumf>, %63, %cst_30 [1] : vector<16x16xf32> to vector<16xf32>
    %65 = vector.shape_cast %64 : vector<16xf32> to vector<16x1xf32>
    %66 = vector.broadcast %65 : vector<16x1xf32> to vector<16x16xf32>
    %67 = arith.subf %63, %66 : vector<16x16xf32>
    %68 = math.exp %67 : vector<16x16xf32>
    %cst_31 = arith.constant dense<0.000000e+00> : vector<16xf32>
    %69 = vector.multi_reduction <add>, %68, %cst_31 [1] : vector<16x16xf32> to vector<16xf32>
    %70 = vector.shape_cast %69 : vector<16xf32> to vector<16x1xf32>
    %71 = tpu.reciprocal %70 {approx = true} : vector<16x1xf32> -> vector<16x1xf32>
    %72 = vector.broadcast %71 : vector<16x1xf32> to vector<16x16xf32>
    %73 = arith.mulf %68, %72 : vector<16x16xf32>
    %cst_32 = arith.constant dense<0.000000e+00> : vector<16x8xf32>
    %74 = tpu.matmul %73, %59, %cst_32 {dimension_numbers = #tpu.dot_dimension_numbers<[1], [0], [0], [1], [0, 0, 1, 1], [], []>} : vector<16x16xf32>, vector<16x8xf32>, vector<16x8xf32> -> vector<16x8xf32>
    %75 = vector.extract_strided_slice %34 {offsets = [8, 0], sizes = [8, 32], strides = [1, 1]} : vector<32x32xf32> to vector<8x32xf32>
    %cst_33 = arith.constant dense<0.000000e+00> : vector<16x32xf32>
    %76 = tpu.matmul %74, %75, %cst_33 {dimension_numbers = #tpu.dot_dimension_numbers<[1], [0], [0], [1], [0, 0, 1, 1], [], []>} : vector<16x8xf32>, vector<8x32xf32>, vector<16x32xf32> -> vector<16x32xf32>
    %77 = arith.addf %56, %76 : vector<16x32xf32>
    %78 = vector.extract_strided_slice %32 {offsets = [0, 16], sizes = [16, 8], strides = [1, 1]} : vector<16x96xf32> to vector<16x8xf32>
    %79 = vector.extract_strided_slice %32 {offsets = [0, 48], sizes = [16, 8], strides = [1, 1]} : vector<16x96xf32> to vector<16x8xf32>
    %80 = vector.extract_strided_slice %32 {offsets = [0, 80], sizes = [16, 8], strides = [1, 1]} : vector<16x96xf32> to vector<16x8xf32>
    %cst_34 = arith.constant dense<0.000000e+00> : vector<16x16xf32>
    %81 = tpu.matmul %78, %79, %cst_34 {dimension_numbers = #tpu.dot_dimension_numbers<[1], [1], [0], [0], [0, 0, 1, 0], [], []>} : vector<16x8xf32>, vector<16x8xf32>, vector<16x16xf32> -> vector<16x16xf32>
    %cst_35 = arith.constant 0.353553385 : f32
    %82 = vector.broadcast %cst_35 : f32 to vector<16x16xf32>
    %83 = arith.mulf %81, %82 : vector<16x16xf32>
    %84 = arith.addf %83, %0 : vector<16x16xf32>
    %cst_36 = arith.constant dense<0xFF800000> : vector<16xf32>
    %85 = vector.multi_reduction <maximumf>, %84, %cst_36 [1] : vector<16x16xf32> to vector<16xf32>
    %86 = vector.shape_cast %85 : vector<16xf32> to vector<16x1xf32>
    %87 = vector.broadcast %86 : vector<16x1xf32> to vector<16x16xf32>
    %88 = arith.subf %84, %87 : vector<16x16xf32>
    %89 = math.exp %88 : vector<16x16xf32>
    %cst_37 = arith.constant dense<0.000000e+00> : vector<16xf32>
    %90 = vector.multi_reduction <add>, %89, %cst_37 [1] : vector<16x16xf32> to vector<16xf32>
    %91 = vector.shape_cast %90 : vector<16xf32> to vector<16x1xf32>
    %92 = tpu.reciprocal %91 {approx = true} : vector<16x1xf32> -> vector<16x1xf32>
    %93 = vector.broadcast %92 : vector<16x1xf32> to vector<16x16xf32>
    %94 = arith.mulf %89, %93 : vector<16x16xf32>
    %cst_38 = arith.constant dense<0.000000e+00> : vector<16x8xf32>
    %95 = tpu.matmul %94, %80, %cst_38 {dimension_numbers = #tpu.dot_dimension_numbers<[1], [0], [0], [1], [0, 0, 1, 1], [], []>} : vector<16x16xf32>, vector<16x8xf32>, vector<16x8xf32> -> vector<16x8xf32>
    %96 = vector.extract_strided_slice %34 {offsets = [16, 0], sizes = [8, 32], strides = [1, 1]} : vector<32x32xf32> to vector<8x32xf32>
    %cst_39 = arith.constant dense<0.000000e+00> : vector<16x32xf32>
    %97 = tpu.matmul %95, %96, %cst_39 {dimension_numbers = #tpu.dot_dimension_numbers<[1], [0], [0], [1], [0, 0, 1, 1], [], []>} : vector<16x8xf32>, vector<8x32xf32>, vector<16x32xf32> -> vector<16x32xf32>
    %98 = arith.addf %77, %97 : vector<16x32xf32>
    %99 = vector.extract_strided_slice %32 {offsets = [0, 24], sizes = [16, 8], strides = [1, 1]} : vector<16x96xf32> to vector<16x8xf32>
    %100 = vector.extract_strided_slice %32 {offsets = [0, 56], sizes = [16, 8], strides = [1, 1]} : vector<16x96xf32> to vector<16x8xf32>
    %101 = vector.extract_strided_slice %32 {offsets = [0, 88], sizes = [16, 8], strides = [1, 1]} : vector<16x96xf32> to vector<16x8xf32>
    %cst_40 = arith.constant dense<0.000000e+00> : vector<16x16xf32>
    %102 = tpu.matmul %99, %100, %cst_40 {dimension_numbers = #tpu.dot_dimension_numbers<[1], [1], [0], [0], [0, 0, 1, 0], [], []>} : vector<16x8xf32>, vector<16x8xf32>, vector<16x16xf32> -> vector<16x16xf32>
    %cst_41 = arith.constant 0.353553385 : f32
    %103 = vector.broadcast %cst_41 : f32 to vector<16x16xf32>
    %104 = arith.mulf %102, %103 : vector<16x16xf32>
    %105 = arith.addf %104, %0 : vector<16x16xf32>
    %cst_42 = arith.constant dense<0xFF800000> : vector<16xf32>
    %106 = vector.multi_reduction <maximumf>, %105, %cst_42 [1] : vector<16x16xf32> to vector<16xf32>
    %107 = vector.shape_cast %106 : vector<16xf32> to vector<16x1xf32>
    %108 = vector.broadcast %107 : vector<16x1xf32> to vector<16x16xf32>
    %109 = arith.subf %105, %108 : vector<16x16xf32>
    %110 = math.exp %109 : vector<16x16xf32>
    %cst_43 = arith.constant dense<0.000000e+00> : vector<16xf32>
    %111 = vector.multi_reduction <add>, %110, %cst_43 [1] : vector<16x16xf32> to vector<16xf32>
    %112 = vector.shape_cast %111 : vector<16xf32> to vector<16x1xf32>
    %113 = tpu.reciprocal %112 {approx = true} : vector<16x1xf32> -> vector<16x1xf32>
    %114 = vector.broadcast %113 : vector<16x1xf32> to vector<16x16xf32>
    %115 = arith.mulf %110, %114 : vector<16x16xf32>
    %cst_44 = arith.constant dense<0.000000e+00> : vector<16x8xf32>
    %116 = tpu.matmul %115, %101, %cst_44 {dimension_numbers = #tpu.dot_dimension_numbers<[1], [0], [0], [1], [0, 0, 1, 1], [], []>} : vector<16x16xf32>, vector<16x8xf32>, vector<16x8xf32> -> vector<16x8xf32>
    %117 = vector.extract_strided_slice %34 {offsets = [24, 0], sizes = [8, 32], strides = [1, 1]} : vector<32x32xf32> to vector<8x32xf32>
    %cst_45 = arith.constant dense<0.000000e+00> : vector<16x32xf32>
    %118 = tpu.matmul %116, %117, %cst_45 {dimension_numbers = #tpu.dot_dimension_numbers<[1], [0], [0], [1], [0, 0, 1, 1], [], []>} : vector<16x8xf32>, vector<8x32xf32>, vector<16x32xf32> -> vector<16x32xf32>
    %119 = arith.addf %98, %118 : vector<16x32xf32>
    %c0_46 = arith.constant 0 : index
    %c0_47 = arith.constant 0 : index
    %c0_48 = arith.constant 0 : index
    %120 = vector.load %arg8[%c0_46, %c0_47, %c0_48] : memref<2x1x32xf32, #tpu.memory_space<vmem>>, vector<1x1x32xf32>
    %121 = vector.shape_cast %120 : vector<1x1x32xf32> to vector<1x32xf32>
    %122 = vector.broadcast %121 : vector<1x32xf32> to vector<16x32xf32>
    %123 = arith.addf %119, %122 : vector<16x32xf32>
    %124 = arith.addf %123, %25 : vector<16x32xf32>
    %c0_49 = arith.constant 0 : index
    %c0_50 = arith.constant 0 : index
    %c0_51 = arith.constant 0 : index
    %125 = vector.load %arg9[%c0_49, %c0_50, %c0_51] : memref<2x1x32xf32, #tpu.memory_space<vmem>>, vector<1x1x32xf32>
    %126 = vector.shape_cast %125 : vector<1x1x32xf32> to vector<1x32xf32>
    %c0_52 = arith.constant 0 : index
    %c0_53 = arith.constant 0 : index
    %c0_54 = arith.constant 0 : index
    %127 = vector.load %arg10[%c0_52, %c0_53, %c0_54] : memref<2x1x32xf32, #tpu.memory_space<vmem>>, vector<1x1x32xf32>
    %128 = vector.shape_cast %127 : vector<1x1x32xf32> to vector<1x32xf32>
    %cst_55 = arith.constant dense<0.000000e+00> : vector<16xf32>
    %129 = vector.multi_reduction <add>, %124, %cst_55 [1] : vector<16x32xf32> to vector<16xf32>
    %130 = vector.shape_cast %129 : vector<16xf32> to vector<16x1xf32>
    %cst_56 = arith.constant 3.200000e+01 : f32
    %131 = vector.broadcast %cst_56 : f32 to vector<16x1xf32>
    %132 = arith.divf %130, %131 : vector<16x1xf32>
    %133 = vector.broadcast %132 : vector<16x1xf32> to vector<16x32xf32>
    %134 = arith.subf %124, %133 : vector<16x32xf32>
    %135 = arith.mulf %134, %134 : vector<16x32xf32>
    %cst_57 = arith.constant dense<0.000000e+00> : vector<16xf32>
    %136 = vector.multi_reduction <add>, %135, %cst_57 [1] : vector<16x32xf32> to vector<16xf32>
    %137 = vector.shape_cast %136 : vector<16xf32> to vector<16x1xf32>
    %cst_58 = arith.constant 3.200000e+01 : f32
    %138 = vector.broadcast %cst_58 : f32 to vector<16x1xf32>
    %139 = arith.divf %137, %138 : vector<16x1xf32>
    %140 = vector.broadcast %132 : vector<16x1xf32> to vector<16x32xf32>
    %141 = arith.subf %124, %140 : vector<16x32xf32>
    %cst_59 = arith.constant 9.99999996E-13 : f32
    %142 = vector.broadcast %cst_59 : f32 to vector<16x1xf32>
    %143 = arith.addf %139, %142 : vector<16x1xf32>
    %144 = math.rsqrt %143 : vector<16x1xf32>
    %145 = vector.broadcast %144 : vector<16x1xf32> to vector<16x32xf32>
    %146 = arith.mulf %141, %145 : vector<16x32xf32>
    %147 = vector.broadcast %126 : vector<1x32xf32> to vector<16x32xf32>
    %148 = arith.mulf %146, %147 : vector<16x32xf32>
    %149 = vector.broadcast %128 : vector<1x32xf32> to vector<16x32xf32>
    %150 = arith.addf %148, %149 : vector<16x32xf32>
    %c0_60 = arith.constant 0 : index
    %c0_61 = arith.constant 0 : index
    %c0_62 = arith.constant 0 : index
    %151 = vector.load %arg11[%c0_60, %c0_61, %c0_62] : memref<2x32x64xf32, #tpu.memory_space<vmem>>, vector<1x32x64xf32>
    %152 = vector.shape_cast %151 : vector<1x32x64xf32> to vector<32x64xf32>
    %cst_63 = arith.constant dense<0.000000e+00> : vector<16x64xf32>
    %153 = tpu.matmul %150, %152, %cst_63 {dimension_numbers = #tpu.dot_dimension_numbers<[1], [0], [0], [1], [0, 0, 1, 1], [], []>} : vector<16x32xf32>, vector<32x64xf32>, vector<16x64xf32> -> vector<16x64xf32>
    %c0_64 = arith.constant 0 : index
    %c0_65 = arith.constant 0 : index
    %c0_66 = arith.constant 0 : index
    %154 = vector.load %arg12[%c0_64, %c0_65, %c0_66] : memref<2x1x64xf32, #tpu.memory_space<vmem>>, vector<1x1x64xf32>
    %155 = vector.shape_cast %154 : vector<1x1x64xf32> to vector<1x64xf32>
    %156 = vector.broadcast %155 : vector<1x64xf32> to vector<16x64xf32>
    %157 = arith.addf %153, %156 : vector<16x64xf32>
    %158 = arith.mulf %157, %157 : vector<16x64xf32>
    %159 = arith.mulf %157, %158 : vector<16x64xf32>
    %cst_67 = arith.constant 4.471500e-02 : f32
    %160 = vector.broadcast %cst_67 : f32 to vector<16x64xf32>
    %161 = arith.mulf %160, %159 : vector<16x64xf32>
    %162 = arith.addf %157, %161 : vector<16x64xf32>
    %cst_68 = arith.constant 0.797884583 : f32
    %163 = vector.broadcast %cst_68 : f32 to vector<16x64xf32>
    %164 = arith.mulf %163, %162 : vector<16x64xf32>
    %165 = math.tanh %164 : vector<16x64xf32>
    %cst_69 = arith.constant 1.000000e+00 : f32
    %166 = vector.broadcast %cst_69 : f32 to vector<16x64xf32>
    %167 = arith.addf %166, %165 : vector<16x64xf32>
    %cst_70 = arith.constant 5.000000e-01 : f32
    %168 = vector.broadcast %cst_70 : f32 to vector<16x64xf32>
    %169 = arith.mulf %168, %167 : vector<16x64xf32>
    %170 = arith.mulf %157, %169 : vector<16x64xf32>
    %c0_71 = arith.constant 0 : index
    %c0_72 = arith.constant 0 : index
    %c0_73 = arith.constant 0 : index
    %171 = vector.load %arg13[%c0_71, %c0_72, %c0_73] : memref<2x64x32xf32, #tpu.memory_space<vmem>>, vector<1x64x32xf32>
    %172 = vector.shape_cast %171 : vector<1x64x32xf32> to vector<64x32xf32>
    %cst_74 = arith.constant dense<0.000000e+00> : vector<16x32xf32>
    %173 = tpu.matmul %170, %172, %cst_74 {dimension_numbers = #tpu.dot_dimension_numbers<[1], [0], [0], [1], [0, 0, 1, 1], [], []>} : vector<16x64xf32>, vector<64x32xf32>, vector<16x32xf32> -> vector<16x32xf32>
    %c0_75 = arith.constant 0 : index
    %c0_76 = arith.constant 0 : index
    %c0_77 = arith.constant 0 : index
    %174 = vector.load %arg14[%c0_75, %c0_76, %c0_77] : memref<2x1x32xf32, #tpu.memory_space<vmem>>, vector<1x1x32xf32>
    %175 = vector.shape_cast %174 : vector<1x1x32xf32> to vector<1x32xf32>
    %176 = vector.broadcast %175 : vector<1x32xf32> to vector<16x32xf32>
    %177 = arith.addf %173, %176 : vector<16x32xf32>
    %178 = arith.addf %177, %150 : vector<16x32xf32>
    %c0_78 = arith.constant 0 : index
    %c0_79 = arith.constant 0 : index
    %c0_80 = arith.constant 0 : index
    %179 = vector.load %arg15[%c0_78, %c0_79, %c0_80] : memref<2x1x32xf32, #tpu.memory_space<vmem>>, vector<1x1x32xf32>
    %180 = vector.shape_cast %179 : vector<1x1x32xf32> to vector<1x32xf32>
    %c0_81 = arith.constant 0 : index
    %c0_82 = arith.constant 0 : index
    %c0_83 = arith.constant 0 : index
    %181 = vector.load %arg16[%c0_81, %c0_82, %c0_83] : memref<2x1x32xf32, #tpu.memory_space<vmem>>, vector<1x1x32xf32>
    %182 = vector.shape_cast %181 : vector<1x1x32xf32> to vector<1x32xf32>
    %cst_84 = arith.constant dense<0.000000e+00> : vector<16xf32>
    %183 = vector.multi_reduction <add>, %178, %cst_84 [1] : vector<16x32xf32> to vector<16xf32>
    %184 = vector.shape_cast %183 : vector<16xf32> to vector<16x1xf32>
    %cst_85 = arith.constant 3.200000e+01 : f32
    %185 = vector.broadcast %cst_85 : f32 to vector<16x1xf32>
    %186 = arith.divf %184, %185 : vector<16x1xf32>
    %187 = vector.broadcast %186 : vector<16x1xf32> to vector<16x32xf32>
    %188 = arith.subf %178, %187 : vector<16x32xf32>
    %189 = arith.mulf %188, %188 : vector<16x32xf32>
    %cst_86 = arith.constant dense<0.000000e+00> : vector<16xf32>
    %190 = vector.multi_reduction <add>, %189, %cst_86 [1] : vector<16x32xf32> to vector<16xf32>
    %191 = vector.shape_cast %190 : vector<16xf32> to vector<16x1xf32>
    %cst_87 = arith.constant 3.200000e+01 : f32
    %192 = vector.broadcast %cst_87 : f32 to vector<16x1xf32>
    %193 = arith.divf %191, %192 : vector<16x1xf32>
    %194 = vector.broadcast %186 : vector<16x1xf32> to vector<16x32xf32>
    %195 = arith.subf %178, %194 : vector<16x32xf32>
    %cst_88 = arith.constant 9.99999996E-13 : f32
    %196 = vector.broadcast %cst_88 : f32 to vector<16x1xf32>
    %197 = arith.addf %193, %196 : vector<16x1xf32>
    %198 = math.rsqrt %197 : vector<16x1xf32>
    %199 = vector.broadcast %198 : vector<16x1xf32> to vector<16x32xf32>
    %200 = arith.mulf %195, %199 : vector<16x32xf32>
    %201 = vector.broadcast %180 : vector<1x32xf32> to vector<16x32xf32>
    %202 = arith.mulf %200, %201 : vector<16x32xf32>
    %203 = vector.broadcast %182 : vector<1x32xf32> to vector<16x32xf32>
    %204 = arith.addf %202, %203 : vector<16x32xf32>
    %c1 = arith.constant 1 : index
    %c0_89 = arith.constant 0 : index
    %c0_90 = arith.constant 0 : index
    %205 = vector.load %arg5[%c1, %c0_89, %c0_90] : memref<2x32x96xf32, #tpu.memory_space<vmem>>, vector<1x32x96xf32>
    %206 = vector.shape_cast %205 : vector<1x32x96xf32> to vector<32x96xf32>
    %cst_91 = arith.constant dense<0.000000e+00> : vector<16x96xf32>
    %207 = tpu.matmul %204, %206, %cst_91 {dimension_numbers = #tpu.dot_dimension_numbers<[1], [0], [0], [1], [0, 0, 1, 1], [], []>} : vector<16x32xf32>, vector<32x96xf32>, vector<16x96xf32> -> vector<16x96xf32>
    %c1_92 = arith.constant 1 : index
    %c0_93 = arith.constant 0 : index
    %c0_94 = arith.constant 0 : index
    %208 = vector.load %arg6[%c1_92, %c0_93, %c0_94] : memref<2x1x96xf32, #tpu.memory_space<vmem>>, vector<1x1x96xf32>
    %209 = vector.shape_cast %208 : vector<1x1x96xf32> to vector<1x96xf32>
    %210 = vector.broadcast %209 : vector<1x96xf32> to vector<16x96xf32>
    %211 = arith.addf %207, %210 : vector<16x96xf32>
    %c1_95 = arith.constant 1 : index
    %c0_96 = arith.constant 0 : index
    %c0_97 = arith.constant 0 : index
    %212 = vector.load %arg7[%c1_95, %c0_96, %c0_97] : memref<2x32x32xf32, #tpu.memory_space<vmem>>, vector<1x32x32xf32>
    %213 = vector.shape_cast %212 : vector<1x32x32xf32> to vector<32x32xf32>
    %cst_98 = arith.constant 0.000000e+00 : f32
    %214 = vector.broadcast %cst_98 : f32 to vector<16x32xf32>
    %215 = vector.extract_strided_slice %211 {offsets = [0, 0], sizes = [16, 8], strides = [1, 1]} : vector<16x96xf32> to vector<16x8xf32>
    %216 = vector.extract_strided_slice %211 {offsets = [0, 32], sizes = [16, 8], strides = [1, 1]} : vector<16x96xf32> to vector<16x8xf32>
    %217 = vector.extract_strided_slice %211 {offsets = [0, 64], sizes = [16, 8], strides = [1, 1]} : vector<16x96xf32> to vector<16x8xf32>
    %cst_99 = arith.constant dense<0.000000e+00> : vector<16x16xf32>
    %218 = tpu.matmul %215, %216, %cst_99 {dimension_numbers = #tpu.dot_dimension_numbers<[1], [1], [0], [0], [0, 0, 1, 0], [], []>} : vector<16x8xf32>, vector<16x8xf32>, vector<16x16xf32> -> vector<16x16xf32>
    %cst_100 = arith.constant 0.353553385 : f32
    %219 = vector.broadcast %cst_100 : f32 to vector<16x16xf32>
    %220 = arith.mulf %218, %219 : vector<16x16xf32>
    %221 = arith.addf %220, %0 : vector<16x16xf32>
    %cst_101 = arith.constant dense<0xFF800000> : vector<16xf32>
    %222 = vector.multi_reduction <maximumf>, %221, %cst_101 [1] : vector<16x16xf32> to vector<16xf32>
    %223 = vector.shape_cast %222 : vector<16xf32> to vector<16x1xf32>
    %224 = vector.broadcast %223 : vector<16x1xf32> to vector<16x16xf32>
    %225 = arith.subf %221, %224 : vector<16x16xf32>
    %226 = math.exp %225 : vector<16x16xf32>
    %cst_102 = arith.constant dense<0.000000e+00> : vector<16xf32>
    %227 = vector.multi_reduction <add>, %226, %cst_102 [1] : vector<16x16xf32> to vector<16xf32>
    %228 = vector.shape_cast %227 : vector<16xf32> to vector<16x1xf32>
    %229 = tpu.reciprocal %228 {approx = true} : vector<16x1xf32> -> vector<16x1xf32>
    %230 = vector.broadcast %229 : vector<16x1xf32> to vector<16x16xf32>
    %231 = arith.mulf %226, %230 : vector<16x16xf32>
    %cst_103 = arith.constant dense<0.000000e+00> : vector<16x8xf32>
    %232 = tpu.matmul %231, %217, %cst_103 {dimension_numbers = #tpu.dot_dimension_numbers<[1], [0], [0], [1], [0, 0, 1, 1], [], []>} : vector<16x16xf32>, vector<16x8xf32>, vector<16x8xf32> -> vector<16x8xf32>
    %233 = vector.extract_strided_slice %213 {offsets = [0, 0], sizes = [8, 32], strides = [1, 1]} : vector<32x32xf32> to vector<8x32xf32>
    %cst_104 = arith.constant dense<0.000000e+00> : vector<16x32xf32>
    %234 = tpu.matmul %232, %233, %cst_104 {dimension_numbers = #tpu.dot_dimension_numbers<[1], [0], [0], [1], [0, 0, 1, 1], [], []>} : vector<16x8xf32>, vector<8x32xf32>, vector<16x32xf32> -> vector<16x32xf32>
    %235 = arith.addf %214, %234 : vector<16x32xf32>
    %236 = vector.extract_strided_slice %211 {offsets = [0, 8], sizes = [16, 8], strides = [1, 1]} : vector<16x96xf32> to vector<16x8xf32>
    %237 = vector.extract_strided_slice %211 {offsets = [0, 40], sizes = [16, 8], strides = [1, 1]} : vector<16x96xf32> to vector<16x8xf32>
    %238 = vector.extract_strided_slice %211 {offsets = [0, 72], sizes = [16, 8], strides = [1, 1]} : vector<16x96xf32> to vector<16x8xf32>
    %cst_105 = arith.constant dense<0.000000e+00> : vector<16x16xf32>
    %239 = tpu.matmul %236, %237, %cst_105 {dimension_numbers = #tpu.dot_dimension_numbers<[1], [1], [0], [0], [0, 0, 1, 0], [], []>} : vector<16x8xf32>, vector<16x8xf32>, vector<16x16xf32> -> vector<16x16xf32>
    %cst_106 = arith.constant 0.353553385 : f32
    %240 = vector.broadcast %cst_106 : f32 to vector<16x16xf32>
    %241 = arith.mulf %239, %240 : vector<16x16xf32>
    %242 = arith.addf %241, %0 : vector<16x16xf32>
    %cst_107 = arith.constant dense<0xFF800000> : vector<16xf32>
    %243 = vector.multi_reduction <maximumf>, %242, %cst_107 [1] : vector<16x16xf32> to vector<16xf32>
    %244 = vector.shape_cast %243 : vector<16xf32> to vector<16x1xf32>
    %245 = vector.broadcast %244 : vector<16x1xf32> to vector<16x16xf32>
    %246 = arith.subf %242, %245 : vector<16x16xf32>
    %247 = math.exp %246 : vector<16x16xf32>
    %cst_108 = arith.constant dense<0.000000e+00> : vector<16xf32>
    %248 = vector.multi_reduction <add>, %247, %cst_108 [1] : vector<16x16xf32> to vector<16xf32>
    %249 = vector.shape_cast %248 : vector<16xf32> to vector<16x1xf32>
    %250 = tpu.reciprocal %249 {approx = true} : vector<16x1xf32> -> vector<16x1xf32>
    %251 = vector.broadcast %250 : vector<16x1xf32> to vector<16x16xf32>
    %252 = arith.mulf %247, %251 : vector<16x16xf32>
    %cst_109 = arith.constant dense<0.000000e+00> : vector<16x8xf32>
    %253 = tpu.matmul %252, %238, %cst_109 {dimension_numbers = #tpu.dot_dimension_numbers<[1], [0], [0], [1], [0, 0, 1, 1], [], []>} : vector<16x16xf32>, vector<16x8xf32>, vector<16x8xf32> -> vector<16x8xf32>
    %254 = vector.extract_strided_slice %213 {offsets = [8, 0], sizes = [8, 32], strides = [1, 1]} : vector<32x32xf32> to vector<8x32xf32>
    %cst_110 = arith.constant dense<0.000000e+00> : vector<16x32xf32>
    %255 = tpu.matmul %253, %254, %cst_110 {dimension_numbers = #tpu.dot_dimension_numbers<[1], [0], [0], [1], [0, 0, 1, 1], [], []>} : vector<16x8xf32>, vector<8x32xf32>, vector<16x32xf32> -> vector<16x32xf32>
    %256 = arith.addf %235, %255 : vector<16x32xf32>
    %257 = vector.extract_strided_slice %211 {offsets = [0, 16], sizes = [16, 8], strides = [1, 1]} : vector<16x96xf32> to vector<16x8xf32>
    %258 = vector.extract_strided_slice %211 {offsets = [0, 48], sizes = [16, 8], strides = [1, 1]} : vector<16x96xf32> to vector<16x8xf32>
    %259 = vector.extract_strided_slice %211 {offsets = [0, 80], sizes = [16, 8], strides = [1, 1]} : vector<16x96xf32> to vector<16x8xf32>
    %cst_111 = arith.constant dense<0.000000e+00> : vector<16x16xf32>
    %260 = tpu.matmul %257, %258, %cst_111 {dimension_numbers = #tpu.dot_dimension_numbers<[1], [1], [0], [0], [0, 0, 1, 0], [], []>} : vector<16x8xf32>, vector<16x8xf32>, vector<16x16xf32> -> vector<16x16xf32>
    %cst_112 = arith.constant 0.353553385 : f32
    %261 = vector.broadcast %cst_112 : f32 to vector<16x16xf32>
    %262 = arith.mulf %260, %261 : vector<16x16xf32>
    %263 = arith.addf %262, %0 : vector<16x16xf32>
    %cst_113 = arith.constant dense<0xFF800000> : vector<16xf32>
    %264 = vector.multi_reduction <maximumf>, %263, %cst_113 [1] : vector<16x16xf32> to vector<16xf32>
    %265 = vector.shape_cast %264 : vector<16xf32> to vector<16x1xf32>
    %266 = vector.broadcast %265 : vector<16x1xf32> to vector<16x16xf32>
    %267 = arith.subf %263, %266 : vector<16x16xf32>
    %268 = math.exp %267 : vector<16x16xf32>
    %cst_114 = arith.constant dense<0.000000e+00> : vector<16xf32>
    %269 = vector.multi_reduction <add>, %268, %cst_114 [1] : vector<16x16xf32> to vector<16xf32>
    %270 = vector.shape_cast %269 : vector<16xf32> to vector<16x1xf32>
    %271 = tpu.reciprocal %270 {approx = true} : vector<16x1xf32> -> vector<16x1xf32>
    %272 = vector.broadcast %271 : vector<16x1xf32> to vector<16x16xf32>
    %273 = arith.mulf %268, %272 : vector<16x16xf32>
    %cst_115 = arith.constant dense<0.000000e+00> : vector<16x8xf32>
    %274 = tpu.matmul %273, %259, %cst_115 {dimension_numbers = #tpu.dot_dimension_numbers<[1], [0], [0], [1], [0, 0, 1, 1], [], []>} : vector<16x16xf32>, vector<16x8xf32>, vector<16x8xf32> -> vector<16x8xf32>
    %275 = vector.extract_strided_slice %213 {offsets = [16, 0], sizes = [8, 32], strides = [1, 1]} : vector<32x32xf32> to vector<8x32xf32>
    %cst_116 = arith.constant dense<0.000000e+00> : vector<16x32xf32>
    %276 = tpu.matmul %274, %275, %cst_116 {dimension_numbers = #tpu.dot_dimension_numbers<[1], [0], [0], [1], [0, 0, 1, 1], [], []>} : vector<16x8xf32>, vector<8x32xf32>, vector<16x32xf32> -> vector<16x32xf32>
    %277 = arith.addf %256, %276 : vector<16x32xf32>
    %278 = vector.extract_strided_slice %211 {offsets = [0, 24], sizes = [16, 8], strides = [1, 1]} : vector<16x96xf32> to vector<16x8xf32>
    %279 = vector.extract_strided_slice %211 {offsets = [0, 56], sizes = [16, 8], strides = [1, 1]} : vector<16x96xf32> to vector<16x8xf32>
    %280 = vector.extract_strided_slice %211 {offsets = [0, 88], sizes = [16, 8], strides = [1, 1]} : vector<16x96xf32> to vector<16x8xf32>
    %cst_117 = arith.constant dense<0.000000e+00> : vector<16x16xf32>
    %281 = tpu.matmul %278, %279, %cst_117 {dimension_numbers = #tpu.dot_dimension_numbers<[1], [1], [0], [0], [0, 0, 1, 0], [], []>} : vector<16x8xf32>, vector<16x8xf32>, vector<16x16xf32> -> vector<16x16xf32>
    %cst_118 = arith.constant 0.353553385 : f32
    %282 = vector.broadcast %cst_118 : f32 to vector<16x16xf32>
    %283 = arith.mulf %281, %282 : vector<16x16xf32>
    %284 = arith.addf %283, %0 : vector<16x16xf32>
    %cst_119 = arith.constant dense<0xFF800000> : vector<16xf32>
    %285 = vector.multi_reduction <maximumf>, %284, %cst_119 [1] : vector<16x16xf32> to vector<16xf32>
    %286 = vector.shape_cast %285 : vector<16xf32> to vector<16x1xf32>
    %287 = vector.broadcast %286 : vector<16x1xf32> to vector<16x16xf32>
    %288 = arith.subf %284, %287 : vector<16x16xf32>
    %289 = math.exp %288 : vector<16x16xf32>
    %cst_120 = arith.constant dense<0.000000e+00> : vector<16xf32>
    %290 = vector.multi_reduction <add>, %289, %cst_120 [1] : vector<16x16xf32> to vector<16xf32>
    %291 = vector.shape_cast %290 : vector<16xf32> to vector<16x1xf32>
    %292 = tpu.reciprocal %291 {approx = true} : vector<16x1xf32> -> vector<16x1xf32>
    %293 = vector.broadcast %292 : vector<16x1xf32> to vector<16x16xf32>
    %294 = arith.mulf %289, %293 : vector<16x16xf32>
    %cst_121 = arith.constant dense<0.000000e+00> : vector<16x8xf32>
    %295 = tpu.matmul %294, %280, %cst_121 {dimension_numbers = #tpu.dot_dimension_numbers<[1], [0], [0], [1], [0, 0, 1, 1], [], []>} : vector<16x16xf32>, vector<16x8xf32>, vector<16x8xf32> -> vector<16x8xf32>
    %296 = vector.extract_strided_slice %213 {offsets = [24, 0], sizes = [8, 32], strides = [1, 1]} : vector<32x32xf32> to vector<8x32xf32>
    %cst_122 = arith.constant dense<0.000000e+00> : vector<16x32xf32>
    %297 = tpu.matmul %295, %296, %cst_122 {dimension_numbers = #tpu.dot_dimension_numbers<[1], [0], [0], [1], [0, 0, 1, 1], [], []>} : vector<16x8xf32>, vector<8x32xf32>, vector<16x32xf32> -> vector<16x32xf32>
    %298 = arith.addf %277, %297 : vector<16x32xf32>
    %c1_123 = arith.constant 1 : index
    %c0_124 = arith.constant 0 : index
    %c0_125 = arith.constant 0 : index
    %299 = vector.load %arg8[%c1_123, %c0_124, %c0_125] : memref<2x1x32xf32, #tpu.memory_space<vmem>>, vector<1x1x32xf32>
    %300 = vector.shape_cast %299 : vector<1x1x32xf32> to vector<1x32xf32>
    %301 = vector.broadcast %300 : vector<1x32xf32> to vector<16x32xf32>
    %302 = arith.addf %298, %301 : vector<16x32xf32>
    %303 = arith.addf %302, %204 : vector<16x32xf32>
    %c1_126 = arith.constant 1 : index
    %c0_127 = arith.constant 0 : index
    %c0_128 = arith.constant 0 : index
    %304 = vector.load %arg9[%c1_126, %c0_127, %c0_128] : memref<2x1x32xf32, #tpu.memory_space<vmem>>, vector<1x1x32xf32>
    %305 = vector.shape_cast %304 : vector<1x1x32xf32> to vector<1x32xf32>
    %c1_129 = arith.constant 1 : index
    %c0_130 = arith.constant 0 : index
    %c0_131 = arith.constant 0 : index
    %306 = vector.load %arg10[%c1_129, %c0_130, %c0_131] : memref<2x1x32xf32, #tpu.memory_space<vmem>>, vector<1x1x32xf32>
    %307 = vector.shape_cast %306 : vector<1x1x32xf32> to vector<1x32xf32>
    %cst_132 = arith.constant dense<0.000000e+00> : vector<16xf32>
    %308 = vector.multi_reduction <add>, %303, %cst_132 [1] : vector<16x32xf32> to vector<16xf32>
    %309 = vector.shape_cast %308 : vector<16xf32> to vector<16x1xf32>
    %cst_133 = arith.constant 3.200000e+01 : f32
    %310 = vector.broadcast %cst_133 : f32 to vector<16x1xf32>
    %311 = arith.divf %309, %310 : vector<16x1xf32>
    %312 = vector.broadcast %311 : vector<16x1xf32> to vector<16x32xf32>
    %313 = arith.subf %303, %312 : vector<16x32xf32>
    %314 = arith.mulf %313, %313 : vector<16x32xf32>
    %cst_134 = arith.constant dense<0.000000e+00> : vector<16xf32>
    %315 = vector.multi_reduction <add>, %314, %cst_134 [1] : vector<16x32xf32> to vector<16xf32>
    %316 = vector.shape_cast %315 : vector<16xf32> to vector<16x1xf32>
    %cst_135 = arith.constant 3.200000e+01 : f32
    %317 = vector.broadcast %cst_135 : f32 to vector<16x1xf32>
    %318 = arith.divf %316, %317 : vector<16x1xf32>
    %319 = vector.broadcast %311 : vector<16x1xf32> to vector<16x32xf32>
    %320 = arith.subf %303, %319 : vector<16x32xf32>
    %cst_136 = arith.constant 9.99999996E-13 : f32
    %321 = vector.broadcast %cst_136 : f32 to vector<16x1xf32>
    %322 = arith.addf %318, %321 : vector<16x1xf32>
    %323 = math.rsqrt %322 : vector<16x1xf32>
    %324 = vector.broadcast %323 : vector<16x1xf32> to vector<16x32xf32>
    %325 = arith.mulf %320, %324 : vector<16x32xf32>
    %326 = vector.broadcast %305 : vector<1x32xf32> to vector<16x32xf32>
    %327 = arith.mulf %325, %326 : vector<16x32xf32>
    %328 = vector.broadcast %307 : vector<1x32xf32> to vector<16x32xf32>
    %329 = arith.addf %327, %328 : vector<16x32xf32>
    %c1_137 = arith.constant 1 : index
    %c0_138 = arith.constant 0 : index
    %c0_139 = arith.constant 0 : index
    %330 = vector.load %arg11[%c1_137, %c0_138, %c0_139] : memref<2x32x64xf32, #tpu.memory_space<vmem>>, vector<1x32x64xf32>
    %331 = vector.shape_cast %330 : vector<1x32x64xf32> to vector<32x64xf32>
    %cst_140 = arith.constant dense<0.000000e+00> : vector<16x64xf32>
    %332 = tpu.matmul %329, %331, %cst_140 {dimension_numbers = #tpu.dot_dimension_numbers<[1], [0], [0], [1], [0, 0, 1, 1], [], []>} : vector<16x32xf32>, vector<32x64xf32>, vector<16x64xf32> -> vector<16x64xf32>
    %c1_141 = arith.constant 1 : index
    %c0_142 = arith.constant 0 : index
    %c0_143 = arith.constant 0 : index
    %333 = vector.load %arg12[%c1_141, %c0_142, %c0_143] : memref<2x1x64xf32, #tpu.memory_space<vmem>>, vector<1x1x64xf32>
    %334 = vector.shape_cast %333 : vector<1x1x64xf32> to vector<1x64xf32>
    %335 = vector.broadcast %334 : vector<1x64xf32> to vector<16x64xf32>
    %336 = arith.addf %332, %335 : vector<16x64xf32>
    %337 = arith.mulf %336, %336 : vector<16x64xf32>
    %338 = arith.mulf %336, %337 : vector<16x64xf32>
    %cst_144 = arith.constant 4.471500e-02 : f32
    %339 = vector.broadcast %cst_144 : f32 to vector<16x64xf32>
    %340 = arith.mulf %339, %338 : vector<16x64xf32>
    %341 = arith.addf %336, %340 : vector<16x64xf32>
    %cst_145 = arith.constant 0.797884583 : f32
    %342 = vector.broadcast %cst_145 : f32 to vector<16x64xf32>
    %343 = arith.mulf %342, %341 : vector<16x64xf32>
    %344 = math.tanh %343 : vector<16x64xf32>
    %cst_146 = arith.constant 1.000000e+00 : f32
    %345 = vector.broadcast %cst_146 : f32 to vector<16x64xf32>
    %346 = arith.addf %345, %344 : vector<16x64xf32>
    %cst_147 = arith.constant 5.000000e-01 : f32
    %347 = vector.broadcast %cst_147 : f32 to vector<16x64xf32>
    %348 = arith.mulf %347, %346 : vector<16x64xf32>
    %349 = arith.mulf %336, %348 : vector<16x64xf32>
    %c1_148 = arith.constant 1 : index
    %c0_149 = arith.constant 0 : index
    %c0_150 = arith.constant 0 : index
    %350 = vector.load %arg13[%c1_148, %c0_149, %c0_150] : memref<2x64x32xf32, #tpu.memory_space<vmem>>, vector<1x64x32xf32>
    %351 = vector.shape_cast %350 : vector<1x64x32xf32> to vector<64x32xf32>
    %cst_151 = arith.constant dense<0.000000e+00> : vector<16x32xf32>
    %352 = tpu.matmul %349, %351, %cst_151 {dimension_numbers = #tpu.dot_dimension_numbers<[1], [0], [0], [1], [0, 0, 1, 1], [], []>} : vector<16x64xf32>, vector<64x32xf32>, vector<16x32xf32> -> vector<16x32xf32>
    %c1_152 = arith.constant 1 : index
    %c0_153 = arith.constant 0 : index
    %c0_154 = arith.constant 0 : index
    %353 = vector.load %arg14[%c1_152, %c0_153, %c0_154] : memref<2x1x32xf32, #tpu.memory_space<vmem>>, vector<1x1x32xf32>
    %354 = vector.shape_cast %353 : vector<1x1x32xf32> to vector<1x32xf32>
    %355 = vector.broadcast %354 : vector<1x32xf32> to vector<16x32xf32>
    %356 = arith.addf %352, %355 : vector<16x32xf32>
    %357 = arith.addf %356, %329 : vector<16x32xf32>
    %c1_155 = arith.constant 1 : index
    %c0_156 = arith.constant 0 : index
    %c0_157 = arith.constant 0 : index
    %358 = vector.load %arg15[%c1_155, %c0_156, %c0_157] : memref<2x1x32xf32, #tpu.memory_space<vmem>>, vector<1x1x32xf32>
    %359 = vector.shape_cast %358 : vector<1x1x32xf32> to vector<1x32xf32>
    %c1_158 = arith.constant 1 : index
    %c0_159 = arith.constant 0 : index
    %c0_160 = arith.constant 0 : index
    %360 = vector.load %arg16[%c1_158, %c0_159, %c0_160] : memref<2x1x32xf32, #tpu.memory_space<vmem>>, vector<1x1x32xf32>
    %361 = vector.shape_cast %360 : vector<1x1x32xf32> to vector<1x32xf32>
    %cst_161 = arith.constant dense<0.000000e+00> : vector<16xf32>
    %362 = vector.multi_reduction <add>, %357, %cst_161 [1] : vector<16x32xf32> to vector<16xf32>
    %363 = vector.shape_cast %362 : vector<16xf32> to vector<16x1xf32>
    %cst_162 = arith.constant 3.200000e+01 : f32
    %364 = vector.broadcast %cst_162 : f32 to vector<16x1xf32>
    %365 = arith.divf %363, %364 : vector<16x1xf32>
    %366 = vector.broadcast %365 : vector<16x1xf32> to vector<16x32xf32>
    %367 = arith.subf %357, %366 : vector<16x32xf32>
    %368 = arith.mulf %367, %367 : vector<16x32xf32>
    %cst_163 = arith.constant dense<0.000000e+00> : vector<16xf32>
    %369 = vector.multi_reduction <add>, %368, %cst_163 [1] : vector<16x32xf32> to vector<16xf32>
    %370 = vector.shape_cast %369 : vector<16xf32> to vector<16x1xf32>
    %cst_164 = arith.constant 3.200000e+01 : f32
    %371 = vector.broadcast %cst_164 : f32 to vector<16x1xf32>
    %372 = arith.divf %370, %371 : vector<16x1xf32>
    %373 = vector.broadcast %365 : vector<16x1xf32> to vector<16x32xf32>
    %374 = arith.subf %357, %373 : vector<16x32xf32>
    %cst_165 = arith.constant 9.99999996E-13 : f32
    %375 = vector.broadcast %cst_165 : f32 to vector<16x1xf32>
    %376 = arith.addf %372, %375 : vector<16x1xf32>
    %377 = math.rsqrt %376 : vector<16x1xf32>
    %378 = vector.broadcast %377 : vector<16x1xf32> to vector<16x32xf32>
    %379 = arith.mulf %374, %378 : vector<16x32xf32>
    %380 = vector.broadcast %359 : vector<1x32xf32> to vector<16x32xf32>
    %381 = arith.mulf %379, %380 : vector<16x32xf32>
    %382 = vector.broadcast %361 : vector<1x32xf32> to vector<16x32xf32>
    %383 = arith.addf %381, %382 : vector<16x32xf32>
    %384 = tpu.iota {dimensions = array<i32: 0>} : vector<2x16xi32>
    %385 = tpu.iota {dimensions = array<i32: 1>} : vector<2x16xi32>
    %c8_i32 = arith.constant 8 : i32
    %386 = vector.broadcast %c8_i32 : i32 to vector<2x16xi32>
    %387 = arith.muli %384, %386 : vector<2x16xi32>
    %388 = arith.cmpi eq, %385, %387 : vector<2x16xi32>
    %389 = arith.extui %388 : vector<2x16xi1> to vector<2x16xi32>
    %390 = arith.sitofp %389 : vector<2x16xi32> to vector<2x16xf32>
    %cst_166 = arith.constant dense<0.000000e+00> : vector<2x32xf32>
    %391 = tpu.matmul %390, %383, %cst_166 {dimension_numbers = #tpu.dot_dimension_numbers<[1], [0], [0], [1], [0, 0, 1, 1], [], []>} : vector<2x16xf32>, vector<16x32xf32>, vector<2x32xf32> -> vector<2x32xf32>
    %c0_167 = arith.constant 0 : index
    %c0_168 = arith.constant 0 : index
    %392 = vector.load %arg17[%c0_167, %c0_168] : memref<32x256xf32, #tpu.memory_space<vmem>>, vector<32x256xf32>
    %cst_169 = arith.constant dense<0.000000e+00> : vector<2x256xf32>
    %393 = tpu.matmul %391, %392, %cst_169 {dimension_numbers = #tpu.dot_dimension_numbers<[1], [0], [0], [1], [0, 0, 1, 1], [], []>} : vector<2x32xf32>, vector<32x256xf32>, vector<2x256xf32> -> vector<2x256xf32>
    %c0_170 = arith.constant 0 : index
    %c0_171 = arith.constant 0 : index
    %394 = vector.load %arg18[%c0_170, %c0_171] : memref<1x256xf32, #tpu.memory_space<vmem>>, vector<1x256xf32>
    %395 = vector.broadcast %394 : vector<1x256xf32> to vector<2x256xf32>
    %396 = arith.addf %393, %395 : vector<2x256xf32>
    %c0_172 = arith.constant 0 : index
    %c0_173 = arith.constant 0 : index
    %397 = vector.load %arg19[%c0_172, %c0_173] : memref<2x256xf32, #tpu.memory_space<vmem>>, vector<2x256xf32>
    tpu.vector_store %arg19[%c0_172, %c0_173], %396 {strides = array<i32>} : memref<2x256xf32, #tpu.memory_space<vmem>>, vector<2x256xf32>,
    return
  }
  func.func @transform_0(%arg0: i32) -> (i32, i32) {
    %c0_i32 = arith.constant 0 : i32
    %c0_i32_0 = arith.constant 0 : i32
    %c0_i32_1 = arith.constant 0 : i32
    return %c0_i32, %c0_i32_0 : i32, i32
  }
  func.func @transform_1(%arg0: i32) -> (i32, i32) {
    %c0_i32 = arith.constant 0 : i32
    %c0_i32_0 = arith.constant 0 : i32
    %c0_i32_1 = arith.constant 0 : i32
    return %c0_i32, %c0_i32_0 : i32, i32
  }
  func.func @transform_2(%arg0: i32) -> (i32, i32) {
    %c0_i32 = arith.constant 0 : i32
    %c0_i32_0 = arith.constant 0 : i32
    %c0_i32_1 = arith.constant 0 : i32
    return %c0_i32, %c0_i32_0 : i32, i32
  }
  func.func @transform_3(%arg0: i32) -> (i32, i32) {
    %c0_i32 = arith.constant 0 : i32
    %c0_i32_0 = arith.constant 0 : i32
    %c0_i32_1 = arith.constant 0 : i32
    return %c0_i32, %c0_i32_0 : i32, i32
  }
  func.func @transform_4(%arg0: i32) -> (i32, i32, i32) {
    %c0_i32 = arith.constant 0 : i32
    %c0_i32_0 = arith.constant 0 : i32
    %c0_i32_1 = arith.constant 0 : i32
    %c0_i32_2 = arith.constant 0 : i32
    return %c0_i32, %c0_i32_0, %c0_i32_1 : i32, i32, i32
  }
  func.func @transform_5(%arg0: i32) -> (i32, i32, i32) {
    %c0_i32 = arith.constant 0 : i32
    %c0_i32_0 = arith.constant 0 : i32
    %c0_i32_1 = arith.constant 0 : i32
    %c0_i32_2 = arith.constant 0 : i32
    return %c0_i32, %c0_i32_0, %c0_i32_1 : i32, i32, i32
  }
  func.func @transform_6(%arg0: i32) -> (i32, i32, i32) {
    %c0_i32 = arith.constant 0 : i32
    %c0_i32_0 = arith.constant 0 : i32
    %c0_i32_1 = arith.constant 0 : i32
    %c0_i32_2 = arith.constant 0 : i32
    return %c0_i32, %c0_i32_0, %c0_i32_1 : i32, i32, i32
  }
  func.func @transform_7(%arg0: i32) -> (i32, i32, i32) {
    %c0_i32 = arith.constant 0 : i32
    %c0_i32_0 = arith.constant 0 : i32
    %c0_i32_1 = arith.constant 0 : i32
    %c0_i32_2 = arith.constant 0 : i32
    return %c0_i32, %c0_i32_0, %c0_i32_1 : i32, i32, i32
  }
  func.func @transform_8(%arg0: i32) -> (i32, i32, i32) {
    %c0_i32 = arith.constant 0 : i32
    %c0_i32_0 = arith.constant 0 : i32
    %c0_i32_1 = arith.constant 0 : i32
    %c0_i32_2 = arith.constant 0 : i32
    return %c0_i32, %c0_i32_0, %c0_i32_1 : i32, i32, i32
  }
  func.func @transform_9(%arg0: i32) -> (i32, i32, i32) {
    %c0_i32 = arith.constant 0 : i32
    %c0_i32_0 = arith.constant 0 : i32
    %c0_i32_1 = arith.constant 0 : i32
    %c0_i32_2 = arith.constant 0 : i32
    return %c0_i32, %c0_i32_0, %c0_i32_1 : i32, i32, i32
  }
  func.func @transform_10(%arg0: i32) -> (i32, i32, i32) {
    %c0_i32 = arith.constant 0 : i32
    %c0_i32_0 = arith.constant 0 : i32
    %c0_i32_1 = arith.constant 0 : i32
    %c0_i32_2 = arith.constant 0 : i32
    return %c0_i32, %c0_i32_0, %c0_i32_1 : i32, i32, i32
  }
  func.func @transform_11(%arg0: i32) -> (i32, i32, i32) {
    %c0_i32 = arith.constant 0 : i32
    %c0_i32_0 = arith.constant 0 : i32
    %c0_i32_1 = arith.constant 0 : i32
    %c0_i32_2 = arith.constant 0 : i32
    return %c0_i32, %c0_i32_0, %c0_i32_1 : i32, i32, i32
  }
  func.func @transform_12(%arg0: i32) -> (i32, i32, i32) {
    %c0_i32 = arith.constant 0 : i32
    %c0_i32_0 = arith.constant 0 : i32
    %c0_i32_1 = arith.constant 0 : i32
    %c0_i32_2 = arith.constant 0 : i32
    return %c0_i32, %c0_i32_0, %c0_i32_1 : i32, i32, i32
  }
  func.func @transform_13(%arg0: i32) -> (i32, i32, i32) {
    %c0_i32 = arith.constant 0 : i32
    %c0_i32_0 = arith.constant 0 : i32
    %c0_i32_1 = arith.constant 0 : i32
    %c0_i32_2 = arith.constant 0 : i32
    return %c0_i32, %c0_i32_0, %c0_i32_1 : i32, i32, i32
  }
  func.func @transform_14(%arg0: i32) -> (i32, i32, i32) {
    %c0_i32 = arith.constant 0 : i32
    %c0_i32_0 = arith.constant 0 : i32
    %c0_i32_1 = arith.constant 0 : i32
    %c0_i32_2 = arith.constant 0 : i32
    return %c0_i32, %c0_i32_0, %c0_i32_1 : i32, i32, i32
  }
  func.func @transform_15(%arg0: i32) -> (i32, i32, i32) {
    %c0_i32 = arith.constant 0 : i32
    %c0_i32_0 = arith.constant 0 : i32
    %c0_i32_1 = arith.constant 0 : i32
    %c0_i32_2 = arith.constant 0 : i32
    return %c0_i32, %c0_i32_0, %c0_i32_1 : i32, i32, i32
  }
  func.func @transform_16(%arg0: i32) -> (i32, i32) {
    %c0_i32 = arith.constant 0 : i32
    %c0_i32_0 = arith.constant 0 : i32
    %c0_i32_1 = arith.constant 0 : i32
    return %c0_i32, %c0_i32_0 : i32, i32
  }
  func.func @transform_17(%arg0: i32) -> (i32, i32) {
    %c0_i32 = arith.constant 0 : i32
    %c0_i32_0 = arith.constant 0 : i32
    %c0_i32_1 = arith.constant 0 : i32
    return %c0_i32, %c0_i32_0 : i32, i32
  }
  func.func @transform_18(%arg0: i32) -> (i32, i32) {
    %c0_i32 = arith.constant 0 : i32
    %c0_i32_0 = arith.constant 0 : i32
    %c0_i32_1 = arith.constant 0 : i32
    return %c0_i32, %c0_i32_0 : i32, i32
  }
}

</mosaic_0001>

<bundles_post_ra>
// kernel: tpu_custom_call.1
= control target key start
LH: loop header
LB: loop body
LE: loop exit
PB: predicated region body
PF: predicated region fallthrough
CT: control target
= control target key end

     0   :  { %s2979_s0 = inlined_call_operand.hbm [shape: f32[16,32], index: 0, kind: input, shape index: {}]   ;;  %s2980_s1 = inlined_call_operand.hbm [shape: f32[16,16], index: 1, kind: input, shape index: {}]   ;;  %s2981_s2 = inlined_call_operand.hbm [shape: f32[1,32], index: 2, kind: input, shape index: {}]   ;;  %s2982_s3 = inlined_call_operand.hbm [shape: f32[1,32], index: 3, kind: input, shape index: {}]   ;;  %s2983_s4 = inlined_call_operand.vmem [shape: f32[2,32,96], index: 4, kind: input, shape index: {}]   ;;  %s2984_s5 = inlined_call_operand.vmem [shape: f32[2,1,96], index: 5, kind: input, shape index: {}]   ;;  %s2985_s6 = inlined_call_operand.vmem [shape: f32[2,32,32], index: 6, kind: input, shape index: {}]   ;;  %s2986_s7 = inlined_call_operand.vmem [shape: f32[2,1,32], index: 7, kind: input, shape index: {}]   ;;  %s2987_s8 = inlined_call_operand.hbm [shape: f32[2,1,32], index: 8, kind: input, shape index: {}]   ;;  %s2988_s9 = inlined_call_operand.vmem [shape: f32[2,1,32], index: 9, kind: input, shape index: {}]   ;;  %s2989_s10 = inlined_call_operand.vmem [shape: f32[2,32,64], index: 10, kind: input, shape index: {}]   ;;  %s2990_s11 = inlined_call_operand.vmem [shape: f32[2,1,64], index: 11, kind: input, shape index: {}]   ;;  %s2991_s12 = inlined_call_operand.vmem [shape: f32[2,64,32], index: 12, kind: input, shape index: {}]   ;;  %s2992_s13 = inlined_call_operand.vmem [shape: f32[2,1,32], index: 13, kind: input, shape index: {}]   ;;  %s2993_s14 = inlined_call_operand.hbm [shape: f32[2,1,32], index: 14, kind: input, shape index: {}]   ;;  %s2994_s15 = inlined_call_operand.vmem [shape: f32[2,1,32], index: 15, kind: input, shape index: {}]   ;;  %s2995_s16 = inlined_call_operand.hbm [shape: f32[32,256], index: 16, kind: input, shape index: {}]   ;;  %s2996_s17 = inlined_call_operand.vmem [shape: f32[1,256], index: 17, kind: input, shape index: {}]   ;;  %s2997_s18 = inlined_call_operand.hbm [shape: f32[2,256], index: 18, kind: output, shape index: {}]  }
   0x1   :  { %3000 = sst [smem:[#allocation20_spill]] %s2979_s0 }
   0x2   :  { %3001 = sst [smem:[#allocation21_spill]] %s2980_s1 }
   0x3   :  { %3002 = sst [smem:[#allocation22_spill]] %s2981_s2 }
   0x4   :  { %3003 = sst [smem:[#allocation23_spill]] %s2996_s17 }
   0x5   :  { %3004 = sst [smem:[#allocation24_spill]] %s2997_s18 }
   0x6   :  { %23 = vsyncpa [#allocation3], 0 }
   0x7   :  { %24 = vsyncpa [#allocation6], 0 }
   0x8   :  { %25 = vsyncpa [#allocation9], 0 }
   0x9   :  { %26 = vsyncpa [#allocation12], 0 }
   0xa   :  { %27 = vsyncpa [#allocation4], 0  ;;  %s3005_s29 = sld [smem:[#allocation21_spill]]  ;;  %s2405_s0 = smov [#allocation5]  }
   0xb   :  { %s47_s19 = sshll.u32 %s2405_s0, 4  ;;  %s70_s21 = sshll.u32 %s2982_s3, 4  ;;  %s48_s19 = int_to_ptr.vmem [resolvable:$true] %s47_s19  ;;  %s71_s21 = int_to_ptr.hbm [resolvable:$true] %s70_s21 }
   0xc   :  { %s2406_s22 = smov 128   ;;  %s2407_s2 = smov 8  }
   0xd   :  { %s2408_s23 = smov [#allocation8]   ;;  %s111_s27 = sshll.u32 %s2993_s14, 4  ;;  %s112_s27 = int_to_ptr.hbm [resolvable:$true] %s111_s27 }
   0xe   :  { %s72_s24 = sshll.u32 %s2408_s23, 4  ;;  %s2409_s28 = smov [#allocation11]   ;;  %s73_s24 = int_to_ptr.vmem [resolvable:$true] %s72_s24 }
   0xf   :  { %75 = dma.hbm_to_vmem [thread:$0]  %s71_s21, 16, %s73_s24, [#allocation9]  }
  0x10   :  { %s45_s30 = sshll.u32 %s3005_s29, 4  ;;  %s113_s29 = sshll.u32 %s2409_s28, 4  ;;  %s46_s30 = int_to_ptr.hbm [resolvable:$true] %s45_s30  ;;  %s114_s29 = int_to_ptr.vmem [resolvable:$true] %s113_s29 }
  0x11   :  { %53 = dma.hbm_to_vmem [thread:$0]  %s46_s30, 256, %s48_s19, [#allocation6], %s2406_s22, %s2406_s22, %s2407_s2  }
  0x12   :  { %s3006_s1 = sld [smem:[#allocation20_spill]]  ;;  %s2998_s20 = smov 16  }
  0x13   :  { %s2411_s17 = smov 1   ;;  %s2412_s30 = smov [#allocation2]  }
  0x14   :  { %119 = dma.hbm_to_vmem [thread:$0]  %s112_s27, 32, %s114_s29, [#allocation12], %s2998_s20, %s2998_s20, %s2411_s17  }
  0x15   :  { %s34_s19 = sshll.u32 %s2412_s30, 4  ;;  %s3007_s24 = sld [smem:[#allocation22_spill]]  ;;  %s35_s19 = int_to_ptr.vmem [resolvable:$true] %s34_s19 }
  0x16   :  { %s88_s18 = sshll.u32 %s2987_s8, 4  ;;  %s2413_s28 = smov [#allocation7]   ;;  %s89_s18 = int_to_ptr.hbm [resolvable:$true] %s88_s18 }
  0x17   :  { %s61_s0 = sshll.u32 %s2413_s28, 4  ;;  %s2414_s27 = smov [#allocation10]   ;;  %s62_s0 = int_to_ptr.vmem [resolvable:$true] %s61_s0 }
  0x18   :  { %s32_s3 = sshll.u32 %s3006_s1, 4  ;;  %s90_s29 = sshll.u32 %s2414_s27, 4  ;;  %s33_s3 = int_to_ptr.hbm [resolvable:$true] %s32_s3  ;;  %s91_s29 = int_to_ptr.vmem [resolvable:$true] %s90_s29 }
  0x19   :  { %40 = dma.hbm_to_vmem [thread:$0]  %s33_s3, 256, %s35_s19, [#allocation3], %s2406_s22, %s2406_s22, %s2407_s2  }
  0x1a   :  { %s126_s20 = sshll.u32 %s2995_s16, 4  ;;  %s3008_s21 = smov 16   ;;  %s127_s20 = int_to_ptr.hbm [resolvable:$true] %s126_s20 }
  0x1b   :  { %s59_s14 = sshll.u32 %s3007_s24, 4  ;;  %s2415_s22 = smov [#allocation13]   ;;  %s60_s14 = int_to_ptr.hbm [resolvable:$true] %s59_s14 }
  0x1c   :  { %64 = dma.hbm_to_vmem [thread:$0]  %s60_s14, 16, %s62_s0, [#allocation6]  }
  0x1d   :  { %96 = dma.hbm_to_vmem [thread:$0]  %s89_s18, 32, %s91_s29, [#allocation9], %s3008_s21, %s3008_s21, %s2411_s17  }
  0x1e   :  { %s128_s2 = sshll.u32 %s2415_s22, 4  ;;  %s2416_s8 = smov 256   ;;  %s129_s2 = int_to_ptr.vmem [resolvable:$true] %s128_s2 }
  0x1f   :  { %134 = dma.hbm_to_vmem [thread:$0]  %s127_s20, 1024, %s129_s2, [#allocation12], %s2416_s8, %s2416_s8, %s3008_s21  }
  0x20   :  { %2395 = dma.done.wait [#allocation3], 256  }
  0x21   :  { %2396 = vsyncadd [#allocation3], 4294967040 }
  0x22   :  { %2397 = dma.done.wait [#allocation6], 272  }
  0x23   :  { %2398 = vsyncadd [#allocation6], 4294967024 }
  0x24   :  { %2399 = dma.done.wait [#allocation9], 48  }
  0x25   :  { %2400 = vsyncadd [#allocation9], 4294967248 }
  0x26   :  { %2401 = dma.done.wait [#allocation12], 1056  }
  0x27   :  { %2402 = vsyncadd [#allocation12], 4294966240  ;;  %vm171_vm0 = vcmask 261120   ;;  %v167_v0 = vld [vmem:[#allocation2] sm:$0xff]  ;;  %v168_v2 = vld [vmem:[#allocation2 + $0x8] sm:$0xff]  ;;  %v2417_v4 = vmov 32.0  }
  0x28   :  { %v172_v1 = vsel %vm171_vm0, %v167_v0, 0.0  ;;  %v175_v3 = vsel %vm171_vm0, %v168_v2, 0.0  ;;  %2107 = vrcp.f32 %v2417_v4  ;;  %v236_v21 = vld [vmem:[%s2983_s4 + $0x18] sm:$0xff]  ;;  %v235_v22 = vld [vmem:[%s2983_s4 + $0x10] sm:$0xff]  ;;  %v234_v23 = vld [vmem:[%s2983_s4 + $0x8] sm:$0xff]  ;;  %s2418_s18 = smov 96  }
  0x29   :  { %173 = vadd.xlane.f32.xlu0 %v172_v1  ;;  %259 = vmatpush.msra.mxu0 %v236_v21  ;;  %v233_v24 = vld [vmem:[%s2983_s4] sm:$0xff]  ;;  %vm280_vm8 = vcmask 64512   ;;  %v2599_v61 = vld [vmem:[#allocation5] sm:$0xff]  ;;  %vm316_vm9 = vcmask 130048   ;;  %s2419_s28 = smov 64   ;;  %s2420_s0 = smov 88  }
  0x2a   :  { %v2089_v39 = vld [vmem:[#allocation7] ss:$0 sm:$0xff]  ;;  %v2090_v43 = vld [vmem:[#allocation8] ss:$0 sm:$0xff]  ;;  %s2421_s27 = smov 120   ;;  %s2422_s29 = smov 72  }
  0x2b   :  { %260 = vmatpush.msra.mxu0 %v235_v22  ;;  %v2091_v54 = vld [vmem:[%s2984_s5] ss:$0 sm:$0xff]  ;;  %s2423_s1 = smov 104   ;;  %s2424_s22 = smov 80  }
  0x2c   :  { %s2425_s2 = smov 112   ;;  %s2426_s8 = smov 56  }
  0x2d   :  { %261 = vmatpush.msra.mxu0 %v234_v23  ;;  %s2427_s16 = smov 48   ;;  %s2428_s17 = smov 40  }
  0x2e   :  { %v2108_v5 = vpop.eup %2107  ;;  %s2430_s21 = smov [#allocation14]  }
  0x2f   :  { %v179_v6 = vmul.f32 32.0, %v2108_v5  ;;  %vm183_vm1 = vweird.f32 %v2108_v5  ;;  %262 = vmatpush.msra.mxu0 %v233_v24  ;;  %s1902_s3 = sshll.u32 %s2430_s21, 4  ;;  %s1903_s3 = int_to_ptr.vmem [resolvable:$true] %s1902_s3 }
  0x31   :  { %176 = vadd.xlane.f32.xlu0 %v175_v3  ;;  %v180_v7 = vsub.f32 1.0, %v179_v6 }
  0x33   :  { %v181_v8 = vmul.f32 %v2108_v5, %v180_v7 }
  0x35   :  { %v182_v9 = vadd.f32 %v2108_v5, %v181_v8 }
  0x37   :  { %v2554_v10 = vsel %vm183_vm1, %v2108_v5, %v182_v9  ;;  %vm925_vm1 = vcmask 523264  }
  0x9c   :  { %v174_v11 = vpop.xlane.xlu0 %173 }
  0x9d   :  { %v185_v12 = vmul.f32 %v2554_v10, %v174_v11  ;;  %v270_v11 = vld [vmem:[%s2985_s6] sm:$0xff] }
  0x9f   :  { %v187_v13 = vsub.f32 %v167_v0, %v185_v12 }
  0xa1   :  { %v189_v14 = vmul.f32 %v187_v13, %v187_v13 }
  0xa3   :  { %v191_v15 = vsel %vm171_vm0, %v189_v14, 0.0 }
  0xa4   :  { %192 = vadd.xlane.f32.xlu1 %v191_v15  ;;  %v177_v16 = vpop.xlane.xlu0 %176 }
  0xa5   :  { %v186_v17 = vmul.f32 %v2554_v10, %v177_v16 }
  0xa7   :  { %v188_v18 = vsub.f32 %v168_v2, %v186_v17  ;;  %v2603_v2 = vld [vmem:[#allocation5 + $0x8] sm:$0xff] }
  0xa9   :  { %v190_v19 = vmul.f32 %v188_v18, %v188_v18 }
  0xab   :  { %v194_v20 = vsel %vm171_vm0, %v190_v19, 0.0 }
  0xac   :  { %195 = vadd.xlane.f32.xlu1 %v194_v20 }
 0x117   :  { %v193_v25 = vpop.xlane.xlu1 %192 }
 0x118   :  { %v197_v26 = vmul.f32 %v193_v25, %v2554_v10 }
 0x11a   :  { %v199_v27 = vadd.f32 1e-12, %v197_v26 }
 0x11c   :  { %2109 = vrsqrt.f32 %v199_v27  ;;  %vm207_vm3 = vweird.f32 %v199_v27 }
 0x11f   :  { %v196_v28 = vpop.xlane.xlu1 %195 }
 0x120   :  { %v198_v29 = vmul.f32 %v196_v28, %v2554_v10 }
 0x122   :  { %v2110_v30 = vpop.eup %2109  ;;  %v200_v31 = vadd.f32 1e-12, %v198_v29 }
 0x123   :  { %v202_v32 = vmul.f32 %v2110_v30, %v199_v27  ;;  %vm208_vm2 = vweird.f32 %v2110_v30 }
 0x124   :  { %2111 = vrsqrt.f32 %v200_v31  ;;  %vm209_vm4 = vmor %vm207_vm3, %vm208_vm2  ;;  %vm217_vm6 = vweird.f32 %v200_v31 }
 0x125   :  { %v203_v33 = vmul.f32 %v2110_v30, %v202_v32 }
 0x127   :  { %v204_v34 = vmul.f32 0.5, %v203_v33 }
 0x129   :  { %v205_v35 = vsub.f32 1.5, %v204_v34 }
 0x12a   :  { %v2112_v36 = vpop.eup %2111 }
 0x12b   :  { %v206_v37 = vmul.f32 %v2110_v30, %v205_v35  ;;  %v212_v38 = vmul.f32 %v2112_v36, %v200_v31  ;;  %vm218_vm5 = vweird.f32 %v2112_v36 }
 0x12c   :  { %vm219_vm7 = vmor %vm217_vm6, %vm218_vm5 }
 0x12d   :  { %v210_v40 = vsel %vm209_vm4, %v2110_v30, %v206_v37  ;;  %v213_v41 = vmul.f32 %v2112_v36, %v212_v38 }
 0x12e   :  { %v221_v42 = vmul.f32 %v210_v40, %v187_v13 }
 0x12f   :  { %v214_v44 = vmul.f32 0.5, %v213_v41 }
 0x130   :  { %v226_v45 = vmul.f32 %v2089_v39, %v221_v42 }
 0x131   :  { %v215_v46 = vsub.f32 1.5, %v214_v44 }
 0x132   :  { %v2574_v47 = vadd.f32 %v2090_v43, %v226_v45 }
 0x133   :  { %v216_v48 = vmul.f32 %v2112_v36, %v215_v46 }
 0x134   :  { %1917 = vmatmul.msk.f32.vlgmr.msra.gmra.mxu0 %vm171_vm0, %v2574_v47 }
 0x135   :  { %v220_v49 = vsel %vm219_vm7, %v2112_v36, %v216_v48 }
 0x136   :  { %v222_v50 = vmul.f32 %v220_v49, %v188_v18 }
 0x138   :  { %v227_v51 = vmul.f32 %v2089_v39, %v222_v50 }
 0x13a   :  { %v2578_v52 = vadd.f32 %v2090_v43, %v227_v51 }
 0x13c   :  { %1918 = vmatmul.msk.f32.gmra.mxu0 %vm171_vm0, %v2578_v52 }
 0x1b1   :  { %v264_v53 = vpop.f32.mrf.mxu0 }
 0x1b2   :  { %v2589_v57 = vadd.f32 %v2091_v54, %v264_v53 }
 0x1b9   :  { %v267_v55 = vpop.f32.mrf.mxu0 }
 0x1ba   :  { %v2585_v56 = vadd.f32 %v2091_v54, %v267_v55 }
 0x1bc   :  { %278 = vrot.lane.b32.xlu2 %v2585_v56, %s2418_s18  ;;  %v2609_v6 = vpack.i.bf16 %v2589_v57, %v2585_v56 }
 0x1c4   :  { %276 = vrot.lane.b32.xlu2 %v2589_v57, %s2418_s18 }
 0x216   :  { %v279_v58 = vpop.permute.xlu2 %278 }
 0x217   :  { %1919 = vmatpush.xpose.msk.msra.mxu1 %vm280_vm8, %v279_v58 }
 0x21e   :  { %v277_v59 = vpop.permute.xlu2 %276 }
 0x21f   :  { %1920 = vmatpush.xpose.msk.msra.mxu1 %vm280_vm8, %v277_v59 }
 0x222   :  { %1921 = vmatmul.msk.f32.vlgmr.msra.gmra.mxu1 %vm280_vm8, %v2589_v57 }
 0x223   :  { %524 = vmatpush.msrb.mxu1 %v270_v11 }
 0x22a   :  { %1922 = vmatmul.msk.f32.gmra.mxu1 %vm280_vm8, %v2585_v56 }
 0x29f   :  { %v306_v60 = vpop.f32.mrf.mxu1 }
 0x2a0   :  { %v312_v62 = vmul.f32 0.35355338, %v306_v60 }
 0x2a2   :  { %v314_v63 = vadd.f32 %v312_v62, %v2599_v61 }
 0x2a4   :  { %v317_v0 = vsel %vm316_vm9, %v314_v63, -inf }
 0x2a5   :  { %318 = vmax.xlane.f32.xlu0 %v317_v0 }
 0x2a7   :  { %v309_v1 = vpop.f32.mrf.mxu1 }
 0x2a8   :  { %v313_v3 = vmul.f32 0.35355338, %v309_v1 }
 0x2aa   :  { %v315_v4 = vadd.f32 %v313_v3, %v2603_v2 }
 0x2ac   :  { %v320_v5 = vsel %vm316_vm9, %v315_v4, -inf }
 0x2ad   :  { %321 = vmax.xlane.f32.xlu1 %v320_v5 }
 0x2b9   :  { %2050 = vrot.lane.b32.xlu0 %v2609_v6, %s2419_s28 }
 0x2c1   :  { %378 = vrot.lane.b32.xlu0 %v2589_v57, %s2420_s0 }
 0x2c9   :  { %374 = vrot.lane.b32.xlu0 %v2589_v57, %s2421_s27 }
 0x2d1   :  { %669 = vrot.lane.b32.xlu0 %v2585_v56, %s2422_s29 }
 0x2d9   :  { %667 = vrot.lane.b32.xlu0 %v2589_v57, %s2422_s29 }
 0x2e1   :  { %663 = vrot.lane.b32.xlu0 %v2589_v57, %s2423_s1 }
 0x318   :  { %v319_v7 = vpop.xlane.xlu0 %318 }
 0x319   :  { %v323_v8 = vsub.f32 %v314_v63, %v319_v7 }
 0x31b   :  { %v325_v9 = vmul.f32 1.442695, %v323_v8 }
 0x31d   :  { %2113 = vpow2.f32 %v325_v9 }
 0x320   :  { %v322_v12 = vpop.xlane.xlu1 %321 }
 0x321   :  { %v324_v13 = vsub.f32 %v315_v4, %v322_v12 }
 0x323   :  { %v2114_v14 = vpop.eup %2113  ;;  %v327_v15 = vmul.f32 1.442695, %v324_v13 }
 0x324   :  { %v329_v16 = vsel %vm316_vm9, %v2114_v14, 0.0 }
 0x325   :  { %2115 = vpow2.f32 %v327_v15  ;;  %330 = vadd.xlane.f32.xlu2 %v329_v16 }
 0x32b   :  { %v2116_v17 = vpop.eup %2115  ;;  %v2051_v18 = vpop.permute.xlu0 %2050 }
 0x32c   :  { %v332_v19 = vsel %vm316_vm9, %v2116_v17, 0.0  ;;  %v2052_v20 = vunpack.i.l.bf16 %v2051_v18  ;;  %v2053_v21 = vunpack.i.h.bf16 %v2051_v18 }
 0x32d   :  { %333 = vadd.xlane.f32.xlu1 %v332_v19 }
 0x32e   :  { %365 = vmatpush.msra.mxu2 %v2052_v20 }
 0x330   :  { %366 = vmatpush.msra.mxu2 %v2053_v21 }
 0x333   :  { %v379_v22 = vpop.permute.xlu0 %378 }
 0x33b   :  { %v375_v23 = vpop.permute.xlu0 %374 }
 0x33d   :  { %538 = vrot.lane.b32.xlu2 %v2585_v56, %s2424_s22 }
 0x343   :  { %v670_v24 = vpop.permute.xlu0 %669 }
 0x344   :  { %1943 = vmatpush.xpose.msk.msra.mxu1 %vm280_vm8, %v670_v24 }
 0x345   :  { %665 = vrot.lane.b32.xlu2 %v2585_v56, %s2423_s1 }
 0x346   :  { %380 = vrot.lane.b32.xlu1 %v2585_v56, %s2420_s0 }
 0x34b   :  { %v668_v25 = vpop.permute.xlu0 %667 }
 0x34c   :  { %1944 = vmatpush.xpose.msk.msra.mxu1 %vm280_vm8, %v668_v25 }
 0x34e   :  { %376 = vrot.lane.b32.xlu1 %v2585_v56, %s2421_s27 }
 0x353   :  { %v664_v40 = vpop.permute.xlu0 %663 }
 0x356   :  { %536 = vrot.lane.b32.xlu1 %v2589_v57, %s2424_s22 }
 0x35e   :  { %532 = vrot.lane.b32.xlu1 %v2589_v57, %s2425_s2 }
 0x366   :  { %534 = vrot.lane.b32.xlu1 %v2585_v56, %s2425_s2 }
 0x398   :  { %v331_v26 = vpop.xlane.xlu2 %330 }
 0x399   :  { %2117 = vrcp.f32 %v331_v26 }
 0x39f   :  { %v2118_v27 = vpop.eup %2117 }
 0x3a0   :  { %v334_v28 = vpop.xlane.xlu1 %333  ;;  %v337_v29 = vmul.f32 %v2118_v27, %v2114_v14  ;;  %v539_v33 = vpop.permute.xlu2 %538 }
 0x3a1   :  { %2119 = vrcp.f32 %v334_v28 }
 0x3a2   :  { %1923 = vmatmul.msk.f32.vlgmr.msra.gmra.mxu2 %vm316_vm9, %v337_v29 }
 0x3a7   :  { %v2120_v30 = vpop.eup %2119 }
 0x3a8   :  { %v338_v31 = vmul.f32 %v2120_v30, %v2116_v17  ;;  %v666_v41 = vpop.permute.xlu2 %665 }
 0x3aa   :  { %1924 = vmatmul.msk.f32.gmra.mxu2 %vm316_vm9, %v338_v31 }
 0x3b8   :  { %v381_v32 = vpop.permute.xlu1 %380 }
 0x3b9   :  { %1925 = vmatpush.xpose.msk.msra.mxu3 %vm280_vm8, %v381_v32 }
 0x3bd   :  { %1926 = vmatpush.xpose.msk.msra.mxu3 %vm280_vm8, %v379_v22 }
 0x3c0   :  { %v377_v34 = vpop.permute.xlu1 %376  ;;  %1927 = vmatmul.msk.f32.vlgmr.msra.gmra.mxu3 %vm280_vm8, %v375_v23 }
 0x3c1   :  { %1935 = vmatpush.xpose.msk.msrb.mxu3 %vm280_vm8, %v539_v33 }
 0x3c8   :  { %v537_v35 = vpop.permute.xlu1 %536  ;;  %1928 = vmatmul.msk.f32.gmra.mxu3 %vm280_vm8, %v377_v34 }
 0x3c9   :  { %1936 = vmatpush.xpose.msk.msrb.mxu3 %vm280_vm8, %v537_v35 }
 0x3d0   :  { %v533_v36 = vpop.permute.xlu1 %532 }
 0x3d1   :  { %1937 = vmatmul.msk.f32.vlgmr.msrb.gmra.mxu3 %vm280_vm8, %v533_v36 }
 0x3d8   :  { %v535_v37 = vpop.permute.xlu1 %534 }
 0x3d9   :  { %1938 = vmatmul.msk.f32.gmra.mxu3 %vm280_vm8, %v535_v37 }
 0x425   :  { %v368_v38 = vpop.f32.mrf.mxu2 }
 0x426   :  { %1933 = vmatmul.msk.f32.vlgmr.msrb.gmra.mxu1 %vm280_vm8, %v368_v38 }
 0x42d   :  { %v371_v39 = vpop.f32.mrf.mxu2 }
 0x42e   :  { %1934 = vmatmul.msk.f32.gmra.mxu1 %vm280_vm8, %v371_v39 }
 0x436   :  { %1945 = vmatmul.msk.f32.vlgmr.msra.gmra.mxu1 %vm280_vm8, %v664_v40 }
 0x43e   :  { %1946 = vmatmul.msk.f32.gmra.mxu1 %vm280_vm8, %v666_v41 }
 0x443   :  { %v407_v42 = vpop.f32.mrf.mxu3 }
 0x444   :  { %v413_v43 = vmul.f32 0.35355338, %v407_v42 }
 0x446   :  { %v415_v44 = vadd.f32 %v413_v43, %v2599_v61 }
 0x448   :  { %v417_v45 = vsel %vm316_vm9, %v415_v44, -inf }
 0x449   :  { %418 = vmax.xlane.f32.xlu0 %v417_v45 }
 0x44b   :  { %v410_v46 = vpop.f32.mrf.mxu3 }
 0x44c   :  { %v414_v48 = vmul.f32 0.35355338, %v410_v46 }
 0x44e   :  { %v416_v49 = vadd.f32 %v414_v48, %v2603_v2 }
 0x450   :  { %v420_v50 = vsel %vm316_vm9, %v416_v49, -inf }
 0x451   :  { %421 = vmax.xlane.f32.xlu1 %v420_v50 }
 0x454   :  { %v565_v51 = vpop.f32.mrf.mxu3 }
 0x455   :  { %v571_v53 = vmul.f32 0.35355338, %v565_v51 }
 0x457   :  { %v573_v54 = vadd.f32 %v571_v53, %v2599_v61 }
 0x459   :  { %v575_v55 = vsel %vm316_vm9, %v573_v54, -inf }
 0x45a   :  { %576 = vmax.xlane.f32.xlu0 %v575_v55 }
 0x45c   :  { %v568_v56 = vpop.f32.mrf.mxu3 }
 0x45d   :  { %v572_v57 = vmul.f32 0.35355338, %v568_v56 }
 0x45f   :  { %v574_v58 = vadd.f32 %v572_v57, %v2603_v2  ;;  %v271_v57 = vld [vmem:[%s2985_s6 + $0x8] sm:$0xff] }
 0x460   :  { %495 = vmatpush.msrb.mxu0 %v271_v57 }
 0x461   :  { %v578_v59 = vsel %vm316_vm9, %v574_v58, -inf }
 0x462   :  { %579 = vmax.xlane.f32.xlu1 %v578_v59 }
 0x4a3   :  { %v2666_v60 = vpop.f32.mrf.mxu1 }
 0x4ab   :  { %v2668_v62 = vpop.f32.mrf.mxu1 }
 0x4b3   :  { %v696_v63 = vpop.f32.mrf.mxu1 }
 0x4b4   :  { %v702_v0 = vmul.f32 0.35355338, %v696_v63  ;;  %v272_v63 = vld [vmem:[%s2985_s6 + $0x10] sm:$0xff] }
 0x4b5   :  { %653 = vmatpush.msra.mxu0 %v272_v63 }
 0x4b6   :  { %v704_v1 = vadd.f32 %v702_v0, %v2599_v61 }
 0x4b8   :  { %v706_v3 = vsel %vm316_vm9, %v704_v1, -inf }
 0x4b9   :  { %707 = vmax.xlane.f32.xlu2 %v706_v3 }
 0x4bb   :  { %v699_v4 = vpop.f32.mrf.mxu1 }
 0x4bc   :  { %v703_v5 = vmul.f32 0.35355338, %v699_v4  ;;  %v419_v7 = vpop.xlane.xlu0 %418 }
 0x4bd   :  { %v423_v8 = vsub.f32 %v415_v44, %v419_v7 }
 0x4be   :  { %v705_v9 = vadd.f32 %v703_v5, %v2603_v2 }
 0x4bf   :  { %v425_v11 = vmul.f32 1.442695, %v423_v8 }
 0x4c0   :  { %v709_v12 = vsel %vm316_vm9, %v705_v9, -inf }
 0x4c1   :  { %2121 = vpow2.f32 %v425_v11  ;;  %710 = vmax.xlane.f32.xlu2 %v709_v12 }
 0x4c4   :  { %v422_v13 = vpop.xlane.xlu1 %421 }
 0x4c5   :  { %v424_v14 = vsub.f32 %v416_v49, %v422_v13 }
 0x4c7   :  { %v2122_v15 = vpop.eup %2121  ;;  %v427_v16 = vmul.f32 1.442695, %v424_v14 }
 0x4c8   :  { %v429_v17 = vsel %vm316_vm9, %v2122_v15, 0.0 }
 0x4c9   :  { %2123 = vpow2.f32 %v427_v16  ;;  %430 = vadd.xlane.f32.xlu0 %v429_v17 }
 0x4cd   :  { %v577_v18 = vpop.xlane.xlu0 %576 }
 0x4ce   :  { %v581_v19 = vsub.f32 %v573_v54, %v577_v18 }
 0x4cf   :  { %v2124_v20 = vpop.eup %2123 }
 0x4d0   :  { %v583_v21 = vmul.f32 1.442695, %v581_v19  ;;  %v432_v22 = vsel %vm316_vm9, %v2124_v20, 0.0 }
 0x4d1   :  { %433 = vadd.xlane.f32.xlu1 %v432_v22 }
 0x4d2   :  { %2125 = vpow2.f32 %v583_v21 }
 0x4d5   :  { %v580_v28 = vpop.xlane.xlu1 %579 }
 0x4d6   :  { %v582_v32 = vsub.f32 %v574_v58, %v580_v28 }
 0x4d8   :  { %v2126_v23 = vpop.eup %2125  ;;  %v585_v35 = vmul.f32 1.442695, %v582_v32 }
 0x4d9   :  { %2055 = vrot.lane.b32.xlu2 %v2609_v6, %s2426_s8  ;;  %v587_v24 = vsel %vm316_vm9, %v2126_v23, 0.0 }
 0x4da   :  { %588 = vadd.xlane.f32.xlu1 %v587_v24  ;;  %v2092_v24 = vld [vmem:[%s2986_s7] ss:$0 sm:$0xff] }
 0x4e1   :  { %2065 = vrot.lane.b32.xlu2 %v2609_v6, %s2427_s16 }
 0x52c   :  { %v708_v25 = vpop.xlane.xlu2 %707 }
 0x52d   :  { %v712_v26 = vsub.f32 %v704_v1, %v708_v25 }
 0x52f   :  { %v714_v27 = vmul.f32 1.442695, %v712_v26 }
 0x531   :  { %2127 = vpow2.f32 %v714_v27 }
 0x534   :  { %v711_v29 = vpop.xlane.xlu2 %710 }
 0x535   :  { %v713_v30 = vsub.f32 %v705_v9, %v711_v29 }
 0x537   :  { %v2128_v31 = vpop.eup %2127  ;;  %v716_v33 = vmul.f32 1.442695, %v713_v30 }
 0x538   :  { %v718_v34 = vsel %vm316_vm9, %v2128_v31, 0.0 }
 0x539   :  { %2129 = vpow2.f32 %v716_v33  ;;  %719 = vadd.xlane.f32.xlu0 %v718_v34 }
 0x53c   :  { %v431_v36 = vpop.xlane.xlu0 %430  ;;  %v2056_v37 = vpop.permute.xlu2 %2055 }
 0x53d   :  { %2131 = vrcp.f32 %v431_v36  ;;  %v2057_v38 = vunpack.i.l.bf16 %v2056_v37  ;;  %v2058_v40 = vunpack.i.h.bf16 %v2056_v37 }
 0x53e   :  { %2133 = vpow2.f32 %v585_v35 }
 0x53f   :  { %v2130_v39 = vpop.eup %2129  ;;  %465 = vmatpush.msrb.mxu2 %v2057_v38 }
 0x540   :  { %v721_v41 = vsel %vm316_vm9, %v2130_v39, 0.0 }
 0x541   :  { %722 = vadd.xlane.f32.xlu1 %v721_v41  ;;  %466 = vmatpush.msrb.mxu2 %v2058_v40 }
 0x543   :  { %v2132_v42 = vpop.eup %2131 }
 0x544   :  { %v434_v43 = vpop.xlane.xlu1 %433  ;;  %v2066_v44 = vpop.permute.xlu2 %2065  ;;  %v437_v45 = vmul.f32 %v2132_v42, %v2122_v15 }
 0x545   :  { %v2134_v46 = vpop.eup %2133  ;;  %2135 = vrcp.f32 %v434_v43  ;;  %v2067_v48 = vunpack.i.l.bf16 %v2066_v44  ;;  %v2068_v49 = vunpack.i.h.bf16 %v2066_v44 }
 0x546   :  { %1929 = vmatmul.msk.f32.vlgmr.msrb.gmra.mxu2 %vm316_vm9, %v437_v45  ;;  %v590_v50 = vsel %vm316_vm9, %v2134_v46, 0.0  ;;  %v860_v45 = vld [vmem:[%s2989_s10 + $0x10] sm:$0xff] }
 0x547   :  { %623 = vmatpush.msra.mxu2 %v2067_v48  ;;  %v858_v48 = vld [vmem:[%s2989_s10] sm:$0xff] }
 0x549   :  { %591 = vadd.xlane.f32.xlu1 %v590_v50  ;;  %624 = vmatpush.msra.mxu2 %v2068_v49 }
 0x54b   :  { %v2136_v51 = vpop.eup %2135 }
 0x54c   :  { %v438_v53 = vmul.f32 %v2136_v51, %v2124_v20 }
 0x54d   :  { %v589_v54 = vpop.xlane.xlu1 %588  ;;  %2060 = vrot.lane.b32.xlu0 %v2609_v6, %s2428_s17  ;;  %v273_v6 = vld [vmem:[%s2985_s6 + $0x18] sm:$0xff] }
 0x54e   :  { %2137 = vrcp.f32 %v589_v54  ;;  %1930 = vmatmul.msk.f32.gmra.mxu2 %vm316_vm9, %v438_v53 }
 0x54f   :  { %784 = vmatpush.msrb.mxu2 %v273_v6 }
 0x554   :  { %v2138_v55 = vpop.eup %2137 }
 0x555   :  { %v595_v56 = vmul.f32 %v2138_v55, %v2126_v23 }
 0x557   :  { %1939 = vmatmul.msk.f32.vlgmr.msra.gmra.mxu2 %vm316_vm9, %v595_v56 }
 0x5ac   :  { %v720_v59 = vpop.xlane.xlu0 %719 }
 0x5ad   :  { %2139 = vrcp.f32 %v720_v59 }
 0x5b3   :  { %v2140_v3 = vpop.eup %2139 }
 0x5b4   :  { %v723_v58 = vpop.xlane.xlu1 %722  ;;  %v726_v8 = vmul.f32 %v2140_v3, %v2128_v31  ;;  %v2093_v3 = vld [vmem:[#allocation10] ss:$0 sm:$0xff] }
 0x5bc   :  { %v592_v0 = vpop.xlane.xlu1 %591 }
 0x5bd   :  { %2141 = vrcp.f32 %v592_v0 }
 0x5be   :  { %2143 = vrcp.f32 %v723_v58 }
 0x5bf   :  { %v2061_v1 = vpop.permute.xlu0 %2060 }
 0x5c0   :  { %v2062_v4 = vunpack.i.l.bf16 %v2061_v1  ;;  %v2063_v5 = vunpack.i.h.bf16 %v2061_v1 }
 0x5c2   :  { %754 = vmatpush.msra.mxu3 %v2062_v4 }
 0x5c3   :  { %v2142_v7 = vpop.eup %2141 }
 0x5c4   :  { %755 = vmatpush.msra.mxu3 %v2063_v5  ;;  %v596_v9 = vmul.f32 %v2142_v7, %v2134_v46  ;;  %v2144_v11 = vpop.eup %2143  ;;  %v859_v46 = vld [vmem:[%s2989_s10 + $0x8] sm:$0xff] }
 0x5c5   :  { %1947 = vmatmul.msk.f32.vlgmr.msra.gmra.mxu3 %vm316_vm9, %v726_v8  ;;  %v727_v13 = vmul.f32 %v2144_v11, %v2130_v39  ;;  %v2094_v8 = vld [vmem:[%s2988_s9] ss:$0 sm:$0xff] }
 0x5c6   :  { %1940 = vmatmul.msk.f32.gmra.mxu2 %vm316_vm9, %v596_v9 }
 0x5c9   :  { %v468_v12 = vpop.f32.mrf.mxu2 }
 0x5ca   :  { %1931 = vmatmul.msk.f32.vlgmr.msrb.gmra.mxu0 %vm280_vm8, %v468_v12 }
 0x5cd   :  { %1948 = vmatmul.msk.f32.gmra.mxu3 %vm316_vm9, %v727_v13 }
 0x5d1   :  { %v471_v14 = vpop.f32.mrf.mxu2 }
 0x5d2   :  { %1932 = vmatmul.msk.f32.gmra.mxu0 %vm280_vm8, %v471_v14 }
 0x5da   :  { %v626_v15 = vpop.f32.mrf.mxu2 }
 0x5db   :  { %1941 = vmatmul.msk.f32.vlgmr.msra.gmra.mxu0 %vm280_vm8, %v626_v15 }
 0x647   :  { %v497_v19 = vpop.f32.mrf.mxu0 }
 0x648   :  { %v757_v16 = vpop.f32.mrf.mxu3  ;;  %v527_v22 = vadd.f32 %v2666_v60, %v497_v19  ;;  %v920_v19 = vld [vmem:[%s2991_s12 + $0x38] sm:$0xff] }
 0x649   :  { %v629_v17 = vpop.f32.mrf.mxu2  ;;  %1949 = vmatmul.msk.f32.vlgmr.msrb.gmra.mxu2 %vm280_vm8, %v757_v16  ;;  %940 = vmatpush.msrb.mxu1 %v920_v19 }
 0x64a   :  { %1942 = vmatmul.msk.f32.gmra.mxu0 %vm280_vm8, %v629_v17 }
 0x64f   :  { %v500_v20 = vpop.f32.mrf.mxu0 }
 0x650   :  { %v760_v18 = vpop.f32.mrf.mxu3  ;;  %v530_v29 = vadd.f32 %v2668_v62, %v500_v20  ;;  %v919_v20 = vld [vmem:[%s2991_s12 + $0x30] sm:$0xff] }
 0x651   :  { %1950 = vmatmul.msk.f32.gmra.mxu2 %vm280_vm8, %v760_v18  ;;  %941 = vmatpush.msrb.mxu1 %v919_v20 }
 0x658   :  { %v655_v21 = vpop.f32.mrf.mxu0 }
 0x659   :  { %v661_v23 = vadd.f32 %v655_v21, %v527_v22  ;;  %v918_v21 = vld [vmem:[%s2991_s12 + $0x28] sm:$0xff]  ;;  %v917_v22 = vld [vmem:[%s2991_s12 + $0x20] sm:$0xff] }
 0x65a   :  { %942 = vmatpush.msrb.mxu1 %v918_v21 }
 0x65c   :  { %943 = vmatpush.msrb.mxu1 %v917_v22 }
 0x6c7   :  { %v658_v28 = vpop.f32.mrf.mxu0 }
 0x6c8   :  { %v662_v31 = vadd.f32 %v658_v28, %v530_v29 }
 0x6cc   :  { %v786_v25 = vpop.f32.mrf.mxu2 }
 0x6cd   :  { %v792_v26 = vadd.f32 %v786_v25, %v661_v23  ;;  %v916_v23 = vld [vmem:[%s2991_s12 + $0x18] sm:$0xff]  ;;  %v914_v25 = vld [vmem:[%s2991_s12 + $0x8] sm:$0xff] }
 0x6ce   :  { %944 = vmatpush.msrb.mxu1 %v916_v23 }
 0x6cf   :  { %v798_v27 = vadd.f32 %v2092_v24, %v792_v26  ;;  %v913_v26 = vld [vmem:[%s2991_s12] sm:$0xff] }
 0x6d1   :  { %v800_v30 = vadd.f32 %v798_v27, %v2574_v47  ;;  %v2095_v27 = vld [vmem:[%s2990_s11] ss:$0 sm:$0xff] }
 0x6d3   :  { %v804_v32 = vsel %vm171_vm0, %v800_v30, 0.0 }
 0x6d4   :  { %v789_v33 = vpop.f32.mrf.mxu2  ;;  %805 = vadd.xlane.f32.xlu0 %v804_v32 }
 0x6d5   :  { %v793_v34 = vadd.f32 %v789_v33, %v662_v31 }
 0x6d7   :  { %v799_v60 = vadd.f32 %v2092_v24, %v793_v34  ;;  %v915_v24 = vld [vmem:[%s2991_s12 + $0x10] sm:$0xff] }
 0x6d8   :  { %945 = vmatpush.msrb.mxu1 %v915_v24 }
 0x6d9   :  { %v801_v35 = vadd.f32 %v799_v60, %v2578_v52  ;;  %v861_v52 = vld [vmem:[%s2989_s10 + $0x18] sm:$0xff] }
 0x6da   :  { %884 = vmatpush.msrb.mxu0 %v861_v52  ;;  %946 = vmatpush.msrb.mxu1 %v914_v25 }
 0x6db   :  { %v807_v36 = vsel %vm171_vm0, %v801_v35, 0.0 }
 0x6dc   :  { %808 = vadd.xlane.f32.xlu2 %v807_v36  ;;  %885 = vmatpush.msrb.mxu0 %v860_v45 }
 0x6dd   :  { %947 = vmatpush.msrb.mxu1 %v913_v26  ;;  %v2097_v26 = vld [vmem:[#allocation11] ss:$0 sm:$0xff] }
 0x6de   :  { %886 = vmatpush.msrb.mxu0 %v859_v46  ;;  %v2096_v46 = vld [vmem:[%s2992_s13] ss:$0 sm:$0xff] }
 0x6e0   :  { %887 = vmatpush.msrb.mxu0 %v858_v48 }
 0x747   :  { %v806_v37 = vpop.xlane.xlu0 %805 }
 0x748   :  { %v810_v38 = vmul.f32 %v806_v37, %v2554_v10 }
 0x74a   :  { %v812_v39 = vsub.f32 %v800_v30, %v810_v38 }
 0x74c   :  { %v814_v40 = vmul.f32 %v812_v39, %v812_v39 }
 0x74e   :  { %v816_v62 = vsel %vm171_vm0, %v814_v40, 0.0 }
 0x74f   :  { %817 = vadd.xlane.f32.xlu1 %v816_v62  ;;  %v809_v47 = vpop.xlane.xlu2 %808 }
 0x750   :  { %v811_v41 = vmul.f32 %v809_v47, %v2554_v10 }
 0x752   :  { %v813_v42 = vsub.f32 %v801_v35, %v811_v41 }
 0x754   :  { %v815_v43 = vmul.f32 %v813_v42, %v813_v42 }
 0x756   :  { %v819_v44 = vsel %vm171_vm0, %v815_v43, 0.0 }
 0x757   :  { %820 = vadd.xlane.f32.xlu1 %v819_v44 }
 0x7c2   :  { %v818_v49 = vpop.xlane.xlu1 %817 }
 0x7c3   :  { %v822_v50 = vmul.f32 %v818_v49, %v2554_v10 }
 0x7c5   :  { %v824_v51 = vadd.f32 1e-12, %v822_v50 }
 0x7c7   :  { %2145 = vrsqrt.f32 %v824_v51  ;;  %vm832_vm11 = vweird.f32 %v824_v51 }
 0x7ca   :  { %v821_v53 = vpop.xlane.xlu1 %820 }
 0x7cb   :  { %v823_v54 = vmul.f32 %v821_v53, %v2554_v10 }
 0x7cd   :  { %v2146_v55 = vpop.eup %2145  ;;  %v825_v56 = vadd.f32 1e-12, %v823_v54 }
 0x7ce   :  { %v827_v57 = vmul.f32 %v2146_v55, %v824_v51  ;;  %vm833_vm10 = vweird.f32 %v2146_v55 }
 0x7cf   :  { %2147 = vrsqrt.f32 %v825_v56  ;;  %vm834_vm12 = vmor %vm832_vm11, %vm833_vm10  ;;  %vm842_vm14 = vweird.f32 %v825_v56 }
 0x7d0   :  { %v828_v58 = vmul.f32 %v2146_v55, %v827_v57 }
 0x7d2   :  { %v829_v59 = vmul.f32 0.5, %v828_v58 }
 0x7d4   :  { %v830_v63 = vsub.f32 1.5, %v829_v59 }
 0x7d5   :  { %v2148_v6 = vpop.eup %2147 }
 0x7d6   :  { %v831_v0 = vmul.f32 %v2146_v55, %v830_v63  ;;  %v837_v1 = vmul.f32 %v2148_v6, %v825_v56  ;;  %vm843_vm13 = vweird.f32 %v2148_v6 }
 0x7d7   :  { %vm844_vm15 = vmor %vm842_vm14, %vm843_vm13 }
 0x7d8   :  { %v835_v4 = vsel %vm834_vm12, %v2146_v55, %v831_v0  ;;  %v838_v5 = vmul.f32 %v2148_v6, %v837_v1 }
 0x7d9   :  { %v846_v7 = vmul.f32 %v835_v4, %v812_v39 }
 0x7da   :  { %v839_v9 = vmul.f32 0.5, %v838_v5 }
 0x7db   :  { %v851_v11 = vmul.f32 %v2093_v3, %v846_v7  ;;  %v1958_v7 = vld [vmem:[%s2983_s4 + $0x38] sm:$0xff] }
 0x7dc   :  { %v840_v12 = vsub.f32 1.5, %v839_v9  ;;  %1041 = vmatpush.msrb.mxu3 %v1958_v7  ;;  %v1956_v9 = vld [vmem:[%s2983_s4 + $0x28] sm:$0xff]  ;;  %v1962_v7 = vld [vmem:[%s2985_s6 + $0x20] sm:$0xff] }
 0x7dd   :  { %v856_v13 = vadd.f32 %v2094_v8, %v851_v11  ;;  %v1955_v11 = vld [vmem:[%s2983_s4 + $0x20] sm:$0xff] }
 0x7de   :  { %v841_v14 = vmul.f32 %v2148_v6, %v840_v12 }
 0x7df   :  { %1951 = vmatmul.msk.f32.vlgmr.msrb.gmra.mxu0 %vm171_vm0, %v856_v13 }
 0x7e0   :  { %v845_v15 = vsel %vm844_vm15, %v2148_v6, %v841_v14 }
 0x7e1   :  { %v847_v16 = vmul.f32 %v845_v15, %v813_v42 }
 0x7e3   :  { %v852_v17 = vmul.f32 %v2093_v3, %v847_v16 }
 0x7e5   :  { %v857_v18 = vadd.f32 %v2094_v8, %v852_v17  ;;  %v1957_v8 = vld [vmem:[%s2983_s4 + $0x30] sm:$0xff] }
 0x7e6   :  { %1042 = vmatpush.msrb.mxu3 %v1957_v8 }
 0x7e7   :  { %1952 = vmatmul.msk.f32.gmra.mxu0 %vm171_vm0, %v857_v18 }
 0x7e8   :  { %1043 = vmatpush.msrb.mxu3 %v1956_v9 }
 0x7ea   :  { %1044 = vmatpush.msrb.mxu3 %v1955_v11 }
 0x85c   :  { %v889_v28 = vpop.f32.mrf.mxu0 }
 0x85d   :  { %v890_v29 = vadd.f32 %v2095_v27, %v889_v28 }
 0x85f   :  { %v895_v30 = vmul.f32 %v890_v29, %v890_v29 }
 0x861   :  { %v897_v31 = vmul.f32 %v895_v30, %v890_v29  ;;  %v2098_v30 = vld [vmem:[%s2994_s15] ss:$0 sm:$0xff] }
 0x863   :  { %v899_v32 = vmul.f32 0.044715, %v897_v31 }
 0x864   :  { %v892_v33 = vpop.f32.mrf.mxu0 }
 0x865   :  { %v901_v34 = vadd.f32 %v899_v32, %v890_v29  ;;  %v893_v60 = vadd.f32 %v2095_v27, %v892_v33 }
 0x867   :  { %v903_v35 = vmul.f32 0.7978846, %v901_v34  ;;  %v896_v36 = vmul.f32 %v893_v60, %v893_v60 }
 0x869   :  { %2149 = vtanh.f32 %v903_v35  ;;  %v898_v37 = vmul.f32 %v896_v36, %v893_v60 }
 0x86b   :  { %v900_v38 = vmul.f32 0.044715, %v898_v37 }
 0x86d   :  { %v902_v39 = vadd.f32 %v900_v38, %v893_v60 }
 0x86f   :  { %v2150_v40 = vpop.eup %2149  ;;  %v904_v62 = vmul.f32 0.7978846, %v902_v39  ;;  %v2099_v39 = vld [vmem:[%s2984_s5 + $0x1] ss:$0 sm:$0xff] }
 0x870   :  { %v907_v47 = vadd.f32 1.0, %v2150_v40 }
 0x871   :  { %2151 = vtanh.f32 %v904_v62 }
 0x872   :  { %v909_v41 = vmul.f32 0.5, %v907_v47 }
 0x874   :  { %v911_v42 = vmul.f32 %v909_v41, %v890_v29 }
 0x876   :  { %1953 = vmatmul.msk.f32.vlgmr.msrb.gmra.mxu1 %vm925_vm1, %v911_v42 }
 0x877   :  { %v2152_v43 = vpop.eup %2151 }
 0x878   :  { %v908_v44 = vadd.f32 1.0, %v2152_v43 }
 0x87a   :  { %v910_v52 = vmul.f32 0.5, %v908_v44 }
 0x87c   :  { %v912_v45 = vmul.f32 %v910_v52, %v893_v60 }
 0x87e   :  { %1954 = vmatmul.msk.f32.gmra.mxu1 %vm925_vm1, %v912_v45 }
 0x8f3   :  { %v949_v48 = vpop.f32.mrf.mxu1 }
 0x8f4   :  { %v950_v49 = vadd.f32 %v2096_v46, %v949_v48 }
 0x8f6   :  { %v955_v50 = vadd.f32 %v950_v49, %v856_v13 }
 0x8f8   :  { %v959_v51 = vsel %vm171_vm0, %v955_v50, 0.0 }
 0x8f9   :  { %960 = vadd.xlane.f32.xlu1 %v959_v51 }
 0x8fb   :  { %v952_v53 = vpop.f32.mrf.mxu1 }
 0x8fc   :  { %v953_v54 = vadd.f32 %v2096_v46, %v952_v53 }
 0x8fe   :  { %v956_v55 = vadd.f32 %v953_v54, %v857_v18 }
 0x900   :  { %v962_v56 = vsel %vm171_vm0, %v956_v55, 0.0 }
 0x901   :  { %963 = vadd.xlane.f32.xlu1 %v962_v56 }
 0x96c   :  { %v961_v57 = vpop.xlane.xlu1 %960 }
 0x96d   :  { %v965_v58 = vmul.f32 %v961_v57, %v2554_v10 }
 0x96f   :  { %v967_v59 = vsub.f32 %v955_v50, %v965_v58 }
 0x971   :  { %v969_v63 = vmul.f32 %v967_v59, %v967_v59 }
 0x973   :  { %v971_v6 = vsel %vm171_vm0, %v969_v63, 0.0 }
 0x974   :  { %972 = vadd.xlane.f32.xlu1 %v971_v6  ;;  %v964_v0 = vpop.xlane.xlu1 %963 }
 0x975   :  { %v966_v1 = vmul.f32 %v964_v0, %v2554_v10 }
 0x977   :  { %v968_v3 = vsub.f32 %v956_v55, %v966_v1 }
 0x979   :  { %v970_v4 = vmul.f32 %v968_v3, %v968_v3 }
 0x97b   :  { %v974_v5 = vsel %vm171_vm0, %v970_v4, 0.0 }
 0x97c   :  { %975 = vadd.xlane.f32.xlu1 %v974_v5 }
 0x9e7   :  { %v973_v12 = vpop.xlane.xlu1 %972 }
 0x9e8   :  { %v977_v13 = vmul.f32 %v973_v12, %v2554_v10 }
 0x9ea   :  { %v979_v14 = vadd.f32 1e-12, %v977_v13 }
 0x9ec   :  { %2153 = vrsqrt.f32 %v979_v14  ;;  %vm987_vm3 = vweird.f32 %v979_v14 }
 0x9ef   :  { %v976_v15 = vpop.xlane.xlu1 %975 }
 0x9f0   :  { %v978_v16 = vmul.f32 %v976_v15, %v2554_v10 }
 0x9f2   :  { %v2154_v17 = vpop.eup %2153  ;;  %v980_v18 = vadd.f32 1e-12, %v978_v16 }
 0x9f3   :  { %v982_v19 = vmul.f32 %v2154_v17, %v979_v14  ;;  %vm988_vm2 = vweird.f32 %v2154_v17 }
 0x9f4   :  { %2155 = vrsqrt.f32 %v980_v18  ;;  %vm989_vm4 = vmor %vm987_vm3, %vm988_vm2  ;;  %vm997_vm6 = vweird.f32 %v980_v18 }
 0x9f5   :  { %v983_v20 = vmul.f32 %v2154_v17, %v982_v19 }
 0x9f7   :  { %v984_v21 = vmul.f32 0.5, %v983_v20 }
 0x9f9   :  { %v985_v22 = vsub.f32 1.5, %v984_v21 }
 0x9fa   :  { %v2156_v23 = vpop.eup %2155 }
 0x9fb   :  { %v986_v24 = vmul.f32 %v2154_v17, %v985_v22  ;;  %v992_v25 = vmul.f32 %v2156_v23, %v980_v18  ;;  %vm998_vm5 = vweird.f32 %v2156_v23 }
 0x9fc   :  { %vm999_vm7 = vmor %vm997_vm6, %vm998_vm5 }
 0x9fd   :  { %v990_v27 = vsel %vm989_vm4, %v2154_v17, %v986_v24  ;;  %v993_v28 = vmul.f32 %v2156_v23, %v992_v25 }
 0x9fe   :  { %v1001_v29 = vmul.f32 %v990_v27, %v967_v59  ;;  %v2201_v27 = vld [vmem:[#allocation5] sm:$0xff] }
 0x9ff   :  { %v994_v31 = vmul.f32 0.5, %v993_v28 }
 0xa00   :  { %v1006_v32 = vmul.f32 %v2097_v26, %v1001_v29 }
 0xa01   :  { %v995_v33 = vsub.f32 1.5, %v994_v31 }
 0xa02   :  { %v2794_v34 = vadd.f32 %v2098_v30, %v1006_v32 }
 0xa03   :  { %v996_v60 = vmul.f32 %v2156_v23, %v995_v33  ;;  %v2202_v33 = vld [vmem:[#allocation5 + $0x8] sm:$0xff] }
 0xa04   :  { %1960 = vmatmul.msk.f32.vlgmr.msrb.gmra.mxu3 %vm171_vm0, %v2794_v34 }
 0xa05   :  { %v1000_v35 = vsel %vm999_vm7, %v2156_v23, %v996_v60 }
 0xa06   :  { %v1002_v36 = vmul.f32 %v1000_v35, %v968_v3 }
 0xa08   :  { %v1007_v37 = vmul.f32 %v2097_v26, %v1002_v36 }
 0xa0a   :  { %v2798_v38 = vadd.f32 %v2098_v30, %v1007_v37 }
 0xa0c   :  { %1961 = vmatmul.msk.f32.gmra.mxu3 %vm171_vm0, %v2798_v38 }
 0xa87   :  { %v1046_v40 = vpop.f32.mrf.mxu3 }
 0xa88   :  { %v1047_v62 = vadd.f32 %v2099_v39, %v1046_v40 }
 0xa8a   :  { %1059 = vrot.lane.b32.xlu0 %v1047_v62, %s2418_s18 }
 0xa8f   :  { %v1049_v47 = vpop.f32.mrf.mxu3 }
 0xa90   :  { %v1050_v41 = vadd.f32 %v2099_v39, %v1049_v47 }
 0xa92   :  { %1061 = vrot.lane.b32.xlu2 %v1050_v41, %s2418_s18  ;;  %v2815_v53 = vpack.i.bf16 %v1047_v62, %v1050_v41 }
 0xaec   :  { %v1062_v42 = vpop.permute.xlu2 %1061 }
 0xaed   :  { %1966 = vmatpush.xpose.msk.msra.mxu2 %vm280_vm8, %v1062_v42 }
 0xafc   :  { %v1060_v43 = vpop.permute.xlu0 %1059 }
 0xafd   :  { %1967 = vmatpush.xpose.msk.msra.mxu2 %vm280_vm8, %v1060_v43 }
 0xb00   :  { %1968 = vmatmul.msk.f32.vlgmr.msra.gmra.mxu2 %vm280_vm8, %v1047_v62 }
 0xb08   :  { %1969 = vmatmul.msk.f32.gmra.mxu2 %vm280_vm8, %v1050_v41 }
 0xb83   :  { %v1088_v44 = vpop.f32.mrf.mxu2 }
 0xb84   :  { %v1094_v52 = vmul.f32 0.35355338, %v1088_v44 }
 0xb86   :  { %v1096_v45 = vadd.f32 %v1094_v52, %v2599_v61 }
 0xb88   :  { %v1098_v46 = vsel %vm316_vm9, %v1096_v45, -inf }
 0xb89   :  { %1099 = vmax.xlane.f32.xlu1 %v1098_v46 }
 0xb8b   :  { %v1091_v48 = vpop.f32.mrf.mxu2 }
 0xb8c   :  { %v1095_v49 = vmul.f32 0.35355338, %v1091_v48 }
 0xb8e   :  { %v1097_v50 = vadd.f32 %v1095_v49, %v2603_v2 }
 0xb90   :  { %v1101_v51 = vsel %vm316_vm9, %v1097_v50, -inf }
 0xb91   :  { %1102 = vmax.xlane.f32.xlu1 %v1101_v51 }
 0xbaa   :  { %2070 = vrot.lane.b32.xlu1 %v2815_v53, %s2419_s28 }
 0xbb2   :  { %1161 = vrot.lane.b32.xlu1 %v1050_v41, %s2420_s0 }
 0xbba   :  { %1159 = vrot.lane.b32.xlu1 %v1047_v62, %s2420_s0 }
 0xbc2   :  { %1157 = vrot.lane.b32.xlu1 %v1050_v41, %s2421_s27 }
 0xbca   :  { %1317 = vrot.lane.b32.xlu1 %v1047_v62, %s2424_s22 }
 0xbd2   :  { %1313 = vrot.lane.b32.xlu1 %v1047_v62, %s2425_s2 }
 0xbda   :  { %1448 = vrot.lane.b32.xlu1 %v1047_v62, %s2422_s29 }
 0xbe2   :  { %1446 = vrot.lane.b32.xlu1 %v1050_v41, %s2423_s1 }
 0xbfc   :  { %v1100_v61 = vpop.xlane.xlu1 %1099 }
 0xbfd   :  { %v1104_v2 = vsub.f32 %v1096_v45, %v1100_v61 }
 0xbff   :  { %v1106_v54 = vmul.f32 1.442695, %v1104_v2 }
 0xc01   :  { %2157 = vpow2.f32 %v1106_v54 }
 0xc04   :  { %v1103_v55 = vpop.xlane.xlu1 %1102 }
 0xc05   :  { %v1105_v56 = vsub.f32 %v1097_v50, %v1103_v55 }
 0xc07   :  { %v2158_v57 = vpop.eup %2157  ;;  %v1108_v58 = vmul.f32 1.442695, %v1105_v56 }
 0xc08   :  { %v1110_v59 = vsel %vm316_vm9, %v2158_v57, 0.0 }
 0xc09   :  { %2159 = vpow2.f32 %v1108_v58  ;;  %1111 = vadd.xlane.f32.xlu0 %v1110_v59 }
 0xc0f   :  { %v2160_v63 = vpop.eup %2159 }
 0xc10   :  { %v1113_v6 = vsel %vm316_vm9, %v2160_v63, 0.0 }
 0xc11   :  { %1114 = vadd.xlane.f32.xlu2 %v1113_v6 }
 0xc1c   :  { %v2071_v0 = vpop.permute.xlu1 %2070 }
 0xc1d   :  { %v2072_v1 = vunpack.i.l.bf16 %v2071_v0  ;;  %1155 = vrot.lane.b32.xlu0 %v1047_v62, %s2421_s27  ;;  %v2073_v3 = vunpack.i.h.bf16 %v2071_v0 }
 0xc1f   :  { %1146 = vmatpush.msra.mxu0 %v2072_v1 }
 0xc21   :  { %1147 = vmatpush.msra.mxu0 %v2073_v3 }
 0xc23   :  { %1305 = vmatpush.msrb.mxu0 %v1962_v7 }
 0xc24   :  { %v1162_v4 = vpop.permute.xlu1 %1161 }
 0xc25   :  { %1450 = vrot.lane.b32.xlu0 %v1050_v41, %s2422_s29  ;;  %1972 = vmatpush.xpose.msk.msra.mxu1 %vm280_vm8, %v1162_v4 }
 0xc29   :  { %1319 = vrot.lane.b32.xlu2 %v1050_v41, %s2424_s22 }
 0xc2c   :  { %v1160_v5 = vpop.permute.xlu1 %1159 }
 0xc2d   :  { %1444 = vrot.lane.b32.xlu0 %v1047_v62, %s2423_s1  ;;  %1973 = vmatpush.xpose.msk.msra.mxu1 %vm280_vm8, %v1160_v5 }
 0xc31   :  { %1315 = vrot.lane.b32.xlu2 %v1050_v41, %s2425_s2 }
 0xc34   :  { %v1158_v9 = vpop.permute.xlu1 %1157 }
 0xc3c   :  { %v1318_v14 = vpop.permute.xlu1 %1317 }
 0xc44   :  { %v1314_v19 = vpop.permute.xlu1 %1313 }
 0xc4c   :  { %v1449_v21 = vpop.permute.xlu1 %1448 }
 0xc54   :  { %v1447_v36 = vpop.permute.xlu1 %1446 }
 0xc7c   :  { %v1112_v8 = vpop.xlane.xlu0 %1111 }
 0xc7d   :  { %2161 = vrcp.f32 %v1112_v8 }
 0xc83   :  { %v2162_v11 = vpop.eup %2161 }
 0xc84   :  { %v1118_v12 = vmul.f32 %v2162_v11, %v2158_v57  ;;  %v1115_v13 = vpop.xlane.xlu2 %1114 }
 0xc85   :  { %2163 = vrcp.f32 %v1115_v13 }
 0xc86   :  { %1970 = vmatmul.msk.f32.vlgmr.msra.gmra.mxu0 %vm316_vm9, %v1118_v12 }
 0xc8b   :  { %v2164_v15 = vpop.eup %2163 }
 0xc8c   :  { %v1320_v16 = vpop.permute.xlu2 %1319  ;;  %v1119_v17 = vmul.f32 %v2164_v15, %v2160_v63 }
 0xc8d   :  { %1982 = vmatpush.xpose.msk.msrb.mxu1 %vm280_vm8, %v1320_v16 }
 0xc8e   :  { %1971 = vmatmul.msk.f32.gmra.mxu0 %vm316_vm9, %v1119_v17 }
 0xc8f   :  { %v1156_v18 = vpop.permute.xlu0 %1155 }
 0xc90   :  { %1974 = vmatmul.msk.f32.vlgmr.msra.gmra.mxu1 %vm280_vm8, %v1156_v18 }
 0xc91   :  { %1983 = vmatpush.xpose.msk.msrb.mxu1 %vm280_vm8, %v1318_v14 }
 0xc94   :  { %v1316_v22 = vpop.permute.xlu2 %1315 }
 0xc97   :  { %v1451_v20 = vpop.permute.xlu0 %1450 }
 0xc98   :  { %1975 = vmatmul.msk.f32.gmra.mxu1 %vm280_vm8, %v1158_v9  ;;  %1990 = vmatpush.xpose.msk.msra.mxu0 %vm280_vm8, %v1451_v20 }
 0xc9c   :  { %1991 = vmatpush.xpose.msk.msra.mxu0 %vm280_vm8, %v1449_v21 }
 0xc9f   :  { %v1445_v30 = vpop.permute.xlu0 %1444 }
 0xca0   :  { %1984 = vmatmul.msk.f32.vlgmr.msrb.gmra.mxu1 %vm280_vm8, %v1314_v19 }
 0xca8   :  { %1985 = vmatmul.msk.f32.gmra.mxu1 %vm280_vm8, %v1316_v22 }
 0xd03   :  { %v1149_v23 = vpop.f32.mrf.mxu0 }
 0xd04   :  { %1980 = vmatmul.msk.f32.vlgmr.msrb.gmra.mxu0 %vm280_vm8, %v1149_v23 }
 0xd0b   :  { %v1152_v24 = vpop.f32.mrf.mxu0 }
 0xd0c   :  { %1981 = vmatmul.msk.f32.gmra.mxu0 %vm280_vm8, %v1152_v24 }
 0xd0d   :  { %v1188_v25 = vpop.f32.mrf.mxu1 }
 0xd0e   :  { %v1194_v26 = vmul.f32 0.35355338, %v1188_v25 }
 0xd10   :  { %v1196_v28 = vadd.f32 %v2201_v27, %v1194_v26 }
 0xd12   :  { %v1198_v29 = vsel %vm316_vm9, %v1196_v28, -inf }
 0xd13   :  { %1199 = vmax.xlane.f32.xlu2 %v1198_v29 }
 0xd14   :  { %1992 = vmatmul.msk.f32.vlgmr.msra.gmra.mxu0 %vm280_vm8, %v1445_v30 }
 0xd15   :  { %v1191_v31 = vpop.f32.mrf.mxu1 }
 0xd16   :  { %v1195_v32 = vmul.f32 0.35355338, %v1191_v31 }
 0xd18   :  { %v1197_v60 = vadd.f32 %v2202_v33, %v1195_v32 }
 0xd1a   :  { %v1201_v35 = vsel %vm316_vm9, %v1197_v60, -inf }
 0xd1b   :  { %1202 = vmax.xlane.f32.xlu0 %v1201_v35 }
 0xd1c   :  { %1993 = vmatmul.msk.f32.gmra.mxu0 %vm280_vm8, %v1447_v36 }
 0xd1d   :  { %v1346_v37 = vpop.f32.mrf.mxu1 }
 0xd1e   :  { %v1352_v39 = vmul.f32 0.35355338, %v1346_v37 }
 0xd20   :  { %v1354_v40 = vadd.f32 %v2201_v27, %v1352_v39 }
 0xd22   :  { %v1356_v62 = vsel %vm316_vm9, %v1354_v40, -inf }
 0xd23   :  { %1357 = vmax.xlane.f32.xlu1 %v1356_v62 }
 0xd25   :  { %v1349_v47 = vpop.f32.mrf.mxu1 }
 0xd26   :  { %v1353_v41 = vmul.f32 0.35355338, %v1349_v47 }
 0xd28   :  { %v1355_v42 = vadd.f32 %v2202_v33, %v1353_v41 }
 0xd2a   :  { %v1359_v43 = vsel %vm316_vm9, %v1355_v42, -inf }
 0xd2b   :  { %1360 = vmax.xlane.f32.xlu2 %v1359_v43 }
 0xd81   :  { %v2856_v44 = vpop.f32.mrf.mxu0 }
 0xd86   :  { %v1200_v52 = vpop.xlane.xlu2 %1199 }
 0xd87   :  { %v1204_v45 = vsub.f32 %v1196_v28, %v1200_v52  ;;  %v1963_v52 = vld [vmem:[%s2985_s6 + $0x28] sm:$0xff] }
 0xd88   :  { %1276 = vmatpush.msrb.mxu2 %v1963_v52 }
 0xd89   :  { %v1206_v46 = vmul.f32 1.442695, %v1204_v45  ;;  %v2858_v48 = vpop.f32.mrf.mxu0 }
 0xd8b   :  { %2165 = vpow2.f32 %v1206_v46 }
 0xd8e   :  { %v1203_v49 = vpop.xlane.xlu0 %1202 }
 0xd8f   :  { %v1205_v50 = vsub.f32 %v1197_v60, %v1203_v49 }
 0xd91   :  { %v2166_v51 = vpop.eup %2165  ;;  %v1208_v61 = vmul.f32 1.442695, %v1205_v50  ;;  %v1477_v2 = vpop.f32.mrf.mxu0 }
 0xd92   :  { %v1483_v54 = vmul.f32 0.35355338, %v1477_v2  ;;  %v1210_v55 = vsel %vm316_vm9, %v2166_v51, 0.0 }
 0xd93   :  { %2167 = vpow2.f32 %v1208_v61  ;;  %1211 = vadd.xlane.f32.xlu1 %v1210_v55 }
 0xd94   :  { %v1485_v56 = vadd.f32 %v2201_v27, %v1483_v54 }
 0xd96   :  { %v1358_v57 = vpop.xlane.xlu1 %1357  ;;  %v1487_v58 = vsel %vm316_vm9, %v1485_v56, -inf }
 0xd97   :  { %v1362_v59 = vsub.f32 %v1354_v40, %v1358_v57  ;;  %1488 = vmax.xlane.f32.xlu0 %v1487_v58  ;;  %v1965_v58 = vld [vmem:[%s2985_s6 + $0x38] sm:$0xff] }
 0xd99   :  { %v2168_v63 = vpop.eup %2167  ;;  %v1364_v6 = vmul.f32 1.442695, %v1362_v59  ;;  %v1480_v0 = vpop.f32.mrf.mxu0 }
 0xd9a   :  { %v1484_v1 = vmul.f32 0.35355338, %v1480_v0  ;;  %v1213_v3 = vsel %vm316_vm9, %v2168_v63, 0.0 }
 0xd9b   :  { %2169 = vpow2.f32 %v1364_v6  ;;  %1214 = vadd.xlane.f32.xlu2 %v1213_v3 }
 0xd9c   :  { %v1486_v5 = vadd.f32 %v2202_v33, %v1484_v1 }
 0xd9e   :  { %v1361_v4 = vpop.xlane.xlu2 %1360  ;;  %v1490_v12 = vsel %vm316_vm9, %v1486_v5, -inf }
 0xd9f   :  { %v1363_v7 = vsub.f32 %v1355_v42, %v1361_v4 }
 0xda1   :  { %v2170_v8 = vpop.eup %2169  ;;  %v1366_v9 = vmul.f32 1.442695, %v1363_v7 }
 0xda2   :  { %v1368_v11 = vsel %vm316_vm9, %v2170_v8, 0.0 }
 0xda3   :  { %2171 = vpow2.f32 %v1366_v9  ;;  %1369 = vadd.xlane.f32.xlu1 %v1368_v11  ;;  %1491 = vmax.xlane.f32.xlu2 %v1490_v12 }
 0xda9   :  { %v2172_v13 = vpop.eup %2171 }
 0xdaa   :  { %v1371_v14 = vsel %vm316_vm9, %v2172_v13, 0.0 }
 0xdab   :  { %1372 = vadd.xlane.f32.xlu1 %v1371_v14  ;;  %2075 = vrot.lane.b32.xlu0 %v2815_v53, %s2426_s8 }
 0xdbb   :  { %2080 = vrot.lane.b32.xlu2 %v2815_v53, %s2427_s16 }
 0xdc4   :  { %2085 = vrot.lane.b32.xlu1 %v2815_v53, %s2428_s17  ;;  %s3009_s17 = sld [smem:[#allocation23_spill]] }
 0xe06   :  { %v1212_v20 = vpop.xlane.xlu1 %1211 }
 0xe0a   :  { %v1489_v15 = vpop.xlane.xlu0 %1488 }
 0xe0b   :  { %v1493_v16 = vsub.f32 %v1485_v56, %v1489_v15 }
 0xe0d   :  { %v1495_v17 = vmul.f32 1.442695, %v1493_v16 }
 0xe0e   :  { %v1215_v18 = vpop.xlane.xlu2 %1214 }
 0xe0f   :  { %2173 = vpow2.f32 %v1495_v17 }
 0xe10   :  { %2175 = vrcp.f32 %v1212_v20 }
 0xe15   :  { %v2174_v19 = vpop.eup %2173 }
 0xe16   :  { %v1492_v21 = vpop.xlane.xlu2 %1491  ;;  %v1499_v22 = vsel %vm316_vm9, %v2174_v19, 0.0  ;;  %v2176_v26 = vpop.eup %2175 }
 0xe17   :  { %v1494_v23 = vsub.f32 %v1486_v5, %v1492_v21  ;;  %1500 = vadd.xlane.f32.xlu0 %v1499_v22  ;;  %v1218_v30 = vmul.f32 %v2176_v26, %v2166_v51  ;;  %v1370_v33 = vpop.xlane.xlu1 %1369  ;;  %v1964_v51 = vld [vmem:[%s2985_s6 + $0x30] sm:$0xff]  ;;  %v2100_v5 = vld [vmem:[%s2986_s7 + $0x1] ss:$0 sm:$0xff] }
 0xe18   :  { %1434 = vmatpush.msra.mxu2 %v1964_v51 }
 0xe19   :  { %v1497_v24 = vmul.f32 1.442695, %v1494_v23 }
 0xe1b   :  { %2177 = vpow2.f32 %v1497_v24 }
 0xe1c   :  { %2179 = vrcp.f32 %v1215_v18 }
 0xe1d   :  { %v2076_v25 = vpop.permute.xlu0 %2075  ;;  %2181 = vrcp.f32 %v1370_v33 }
 0xe1e   :  { %v2077_v27 = vunpack.i.l.bf16 %v2076_v25  ;;  %v2081_v28 = vpop.permute.xlu2 %2080  ;;  %v2078_v53 = vunpack.i.h.bf16 %v2076_v25 }
 0xe1f   :  { %v2082_v31 = vunpack.i.l.bf16 %v2081_v28  ;;  %v2083_v60 = vunpack.i.h.bf16 %v2081_v28  ;;  %v1373_v37 = vpop.xlane.xlu1 %1372  ;;  %v2002_v28 = vld [vmem:[%s2989_s10 + $0x30] sm:$0xff] }
 0xe20   :  { %1246 = vmatpush.msra.mxu3 %v2077_v27  ;;  %2183 = vrcp.f32 %v1373_v37 }
 0xe21   :  { %v2178_v29 = vpop.eup %2177 }
 0xe22   :  { %1247 = vmatpush.msra.mxu3 %v2078_v53  ;;  %v1502_v32 = vsel %vm316_vm9, %v2178_v29, 0.0  ;;  %v2180_v35 = vpop.eup %2179  ;;  %v2001_v53 = vld [vmem:[%s2989_s10 + $0x28] sm:$0xff] }
 0xe23   :  { %1976 = vmatmul.msk.f32.vlgmr.msra.gmra.mxu3 %vm316_vm9, %v1218_v30  ;;  %1503 = vadd.xlane.f32.xlu2 %v1502_v32  ;;  %v1219_v36 = vmul.f32 %v2180_v35, %v2168_v63  ;;  %v2182_v39 = vpop.eup %2181 }
 0xe24   :  { %1404 = vmatpush.msrb.mxu3 %v2082_v31  ;;  %v1376_v40 = vmul.f32 %v2182_v39, %v2170_v8 }
 0xe26   :  { %1405 = vmatpush.msrb.mxu3 %v2083_v60  ;;  %v2184_v62 = vpop.eup %2183 }
 0xe27   :  { %v1377_v43 = vmul.f32 %v2184_v62, %v2172_v13 }
 0xe28   :  { %1565 = vmatpush.msra.mxu3 %v1965_v58 }
 0xe2b   :  { %1977 = vmatmul.msk.f32.gmra.mxu3 %vm316_vm9, %v1219_v36 }
 0xe33   :  { %1986 = vmatmul.msk.f32.vlgmr.msrb.gmra.mxu3 %vm316_vm9, %v1376_v40 }
 0xe36   :  { %v2086_v47 = vpop.permute.xlu1 %2085 }
 0xe37   :  { %v2087_v41 = vunpack.i.l.bf16 %v2086_v47  ;;  %v2088_v42 = vunpack.i.h.bf16 %v2086_v47 }
 0xe39   :  { %1535 = vmatpush.msra.mxu1 %v2087_v41  ;;  %v2101_v41 = vld [vmem:[#allocation10 + $0x1] ss:$0 sm:$0xff] }
 0xe3b   :  { %1987 = vmatmul.msk.f32.gmra.mxu3 %vm316_vm9, %v1377_v43  ;;  %1536 = vmatpush.msra.mxu1 %v2088_v42 }
 0xe8a   :  { %v1501_v45 = vpop.xlane.xlu0 %1500 }
 0xe8b   :  { %2185 = vrcp.f32 %v1501_v45  ;;  %v2102_v45 = vld [vmem:[%s2988_s9 + $0x1] ss:$0 sm:$0xff] }
 0xe91   :  { %v2186_v46 = vpop.eup %2185 }
 0xe92   :  { %v1507_v49 = vmul.f32 %v2186_v46, %v2174_v19 }
 0xe94   :  { %1994 = vmatmul.msk.f32.vlgmr.msra.gmra.mxu1 %vm316_vm9, %v1507_v49 }
 0xe96   :  { %v1504_v50 = vpop.xlane.xlu2 %1503 }
 0xe97   :  { %2187 = vrcp.f32 %v1504_v50 }
 0xe9d   :  { %v2188_v61 = vpop.eup %2187 }
 0xe9e   :  { %v1508_v2 = vmul.f32 %v2188_v61, %v2178_v29  ;;  %v2000_v29 = vld [vmem:[%s2989_s10 + $0x20] sm:$0xff] }
 0xea0   :  { %1995 = vmatmul.msk.f32.gmra.mxu1 %vm316_vm9, %v1508_v2 }
 0xea6   :  { %v1249_v54 = vpop.f32.mrf.mxu3 }
 0xea7   :  { %1978 = vmatmul.msk.f32.vlgmr.msrb.gmra.mxu2 %vm280_vm8, %v1249_v54 }
 0xeae   :  { %v1252_v55 = vpop.f32.mrf.mxu3 }
 0xeaf   :  { %1979 = vmatmul.msk.f32.gmra.mxu2 %vm280_vm8, %v1252_v55 }
 0xeb6   :  { %v1407_v56 = vpop.f32.mrf.mxu3 }
 0xeb7   :  { %1988 = vmatmul.msk.f32.vlgmr.msra.gmra.mxu2 %vm280_vm8, %v1407_v56 }
 0xebe   :  { %v1410_v57 = vpop.f32.mrf.mxu3 }
 0xebf   :  { %1989 = vmatmul.msk.f32.gmra.mxu2 %vm280_vm8, %v1410_v57 }
 0xf11   :  { %v1538_v59 = vpop.f32.mrf.mxu1 }
 0xf12   :  { %1996 = vmatmul.msk.f32.vlgmr.msra.gmra.mxu3 %vm280_vm8, %v1538_v59  ;;  %v2014_v59 = vld [vmem:[%s2991_s12 + $0x78] sm:$0xff] }
 0xf13   :  { %1727 = vmatpush.msrb.mxu0 %v2014_v59 }
 0xf1d   :  { %v1541_v63 = vpop.f32.mrf.mxu1 }
 0xf1e   :  { %1997 = vmatmul.msk.f32.gmra.mxu3 %vm280_vm8, %v1541_v63  ;;  %v2013_v63 = vld [vmem:[%s2991_s12 + $0x70] sm:$0xff] }
 0xf1f   :  { %1728 = vmatpush.msrb.mxu0 %v2013_v63 }
 0xf2a   :  { %v1278_v6 = vpop.f32.mrf.mxu2 }
 0xf2b   :  { %v1308_v3 = vadd.f32 %v2856_v44, %v1278_v6  ;;  %v2012_v6 = vld [vmem:[%s2991_s12 + $0x68] sm:$0xff] }
 0xf2c   :  { %1729 = vmatpush.msrb.mxu0 %v2012_v6 }
 0xf32   :  { %v1281_v0 = vpop.f32.mrf.mxu2 }
 0xf33   :  { %v1311_v14 = vadd.f32 %v2858_v48, %v1281_v0  ;;  %v2011_v0 = vld [vmem:[%s2991_s12 + $0x60] sm:$0xff] }
 0xf34   :  { %1730 = vmatpush.msrb.mxu0 %v2011_v0 }
 0xf3a   :  { %v1436_v1 = vpop.f32.mrf.mxu2 }
 0xf3b   :  { %v1442_v4 = vadd.f32 %v1436_v1, %v1308_v3  ;;  %v2010_v1 = vld [vmem:[%s2991_s12 + $0x58] sm:$0xff]  ;;  %v2009_v3 = vld [vmem:[%s2991_s12 + $0x50] sm:$0xff] }
 0xf3c   :  { %1731 = vmatpush.msrb.mxu0 %v2010_v1 }
 0xf3e   :  { %1732 = vmatpush.msrb.mxu0 %v2009_v3  ;;  %v1802_v3 = vlaneseq }
 0xf42   :  { %v1439_v13 = vpop.f32.mrf.mxu2 }
 0xf43   :  { %v1443_v15 = vadd.f32 %v1439_v13, %v1311_v14 }
 0xf95   :  { %v1567_v7 = vpop.f32.mrf.mxu3 }
 0xf96   :  { %v1573_v8 = vadd.f32 %v1567_v7, %v1442_v4  ;;  %v2008_v4 = vld [vmem:[%s2991_s12 + $0x48] sm:$0xff]  ;;  %v2103_v7 = vld [vmem:[%s2990_s11 + $0x1] ss:$0 sm:$0xff] }
 0xf97   :  { %1733 = vmatpush.msrb.mxu0 %v2008_v4 }
 0xf98   :  { %v1580_v9 = vadd.f32 %v2100_v5, %v1573_v8 }
 0xf9a   :  { %v1582_v11 = vadd.f32 %v1580_v9, %v2794_v34 }
 0xf9c   :  { %v1588_v12 = vsel %vm171_vm0, %v1582_v11, 0.0 }
 0xf9d   :  { %1589 = vadd.xlane.f32.xlu1 %v1588_v12 }
 0xfa1   :  { %v1570_v16 = vpop.f32.mrf.mxu3 }
 0xfa2   :  { %v1574_v17 = vadd.f32 %v1570_v16, %v1443_v15 }
 0xfa4   :  { %v1581_v44 = vadd.f32 %v2100_v5, %v1574_v17  ;;  %v2007_v5 = vld [vmem:[%s2991_s12 + $0x40] sm:$0xff] }
 0xfa5   :  { %1734 = vmatpush.msrb.mxu0 %v2007_v5 }
 0xfa6   :  { %v1583_v18 = vadd.f32 %v1581_v44, %v2798_v38  ;;  %v2003_v38 = vld [vmem:[%s2989_s10 + $0x38] sm:$0xff]  ;;  %s3010_s10 = sld [smem:[#allocation24_spill]] }
 0xfa7   :  { %1670 = vmatpush.msrb.mxu2 %v2003_v38  ;;  %v2104_v38 = vld [vmem:[%s2992_s13 + $0x1] ss:$0 sm:$0xff] }
 0xfa8   :  { %v1591_v19 = vsel %vm171_vm0, %v1583_v18, 0.0 }
 0xfa9   :  { %1592 = vadd.xlane.f32.xlu0 %v1591_v19  ;;  %1671 = vmatpush.msrb.mxu2 %v2002_v28 }
 0xfab   :  { %1672 = vmatpush.msrb.mxu2 %v2001_v53 }
 0xfac   :  { %s1904_s23 = sshll.u32 %s3010_s10, 4  ;;  %s1905_s23 = int_to_ptr.hbm [resolvable:$true] %s1904_s23 }
 0xfad   :  { %1673 = vmatpush.msrb.mxu2 %v2000_v29 }
0x1010   :  { %v1590_v20 = vpop.xlane.xlu1 %1589 }
0x1011   :  { %v1594_v21 = vmul.f32 %v1590_v20, %v2554_v10 }
0x1013   :  { %v1596_v22 = vsub.f32 %v1582_v11, %v1594_v21 }
0x1015   :  { %v1598_v34 = vmul.f32 %v1596_v22, %v1596_v22 }
0x1017   :  { %v1600_v23 = vsel %vm171_vm0, %v1598_v34, 0.0 }
0x1018   :  { %1601 = vadd.xlane.f32.xlu0 %v1600_v23 }
0x101c   :  { %v1593_v24 = vpop.xlane.xlu0 %1592 }
0x101d   :  { %v1595_v48 = vmul.f32 %v1593_v24, %v2554_v10 }
0x101f   :  { %v1597_v25 = vsub.f32 %v1583_v18, %v1595_v48 }
0x1021   :  { %v1599_v26 = vmul.f32 %v1597_v25, %v1597_v25 }
0x1023   :  { %v1603_v27 = vsel %vm171_vm0, %v1599_v26, 0.0 }
0x1024   :  { %1604 = vadd.xlane.f32.xlu0 %v1603_v27 }
0x108b   :  { %v1602_v30 = vpop.xlane.xlu0 %1601 }
0x108c   :  { %v1606_v31 = vmul.f32 %v1602_v30, %v2554_v10 }
0x108e   :  { %v1608_v32 = vadd.f32 1e-12, %v1606_v31 }
0x1090   :  { %2189 = vrsqrt.f32 %v1608_v32  ;;  %vm1616_vm10 = vweird.f32 %v1608_v32 }
0x1096   :  { %v2190_v33 = vpop.eup %2189 }
0x1097   :  { %v1611_v60 = vmul.f32 %v2190_v33, %v1608_v32  ;;  %v1605_v35 = vpop.xlane.xlu0 %1604  ;;  %vm1617_vm8 = vweird.f32 %v2190_v33 }
0x1098   :  { %v1607_v36 = vmul.f32 %v1605_v35, %v2554_v10  ;;  %vm1618_vm11 = vmor %vm1616_vm10, %vm1617_vm8 }
0x1099   :  { %v1612_v37 = vmul.f32 %v2190_v33, %v1611_v60 }
0x109a   :  { %v1609_v39 = vadd.f32 1e-12, %v1607_v36 }
0x109b   :  { %v1613_v40 = vmul.f32 0.5, %v1612_v37 }
0x109c   :  { %2191 = vrsqrt.f32 %v1609_v39  ;;  %vm1626_vm13 = vweird.f32 %v1609_v39 }
0x109d   :  { %v1614_v62 = vsub.f32 1.5, %v1613_v40 }
0x109f   :  { %v1615_v47 = vmul.f32 %v2190_v33, %v1614_v62 }
0x10a1   :  { %v1619_v42 = vsel %vm1618_vm11, %v2190_v33, %v1615_v47 }
0x10a2   :  { %v2192_v43 = vpop.eup %2191  ;;  %v1630_v52 = vmul.f32 %v1619_v42, %v1596_v22 }
0x10a3   :  { %v1621_v46 = vmul.f32 %v2192_v43, %v1609_v39  ;;  %vm1627_vm12 = vweird.f32 %v2192_v43 }
0x10a4   :  { %v1635_v49 = vmul.f32 %v2101_v41, %v1630_v52  ;;  %vm1628_vm14 = vmor %vm1626_vm13, %vm1627_vm12 }
0x10a5   :  { %v1622_v50 = vmul.f32 %v2192_v43, %v1621_v46 }
0x10a6   :  { %v1640_v51 = vadd.f32 %v2102_v45, %v1635_v49 }
0x10a7   :  { %v1623_v61 = vmul.f32 0.5, %v1622_v50 }
0x10a8   :  { %2005 = vmatmul.msk.f32.vlgmr.msrb.gmra.mxu2 %vm171_vm0, %v1640_v51 }
0x10a9   :  { %v1624_v2 = vsub.f32 1.5, %v1623_v61  ;;  %v1839_v61 = vld [vmem:[#allocation13 + $0x30] sm:$0xff] }
0x10aa   :  { %1862 = vmatpush.msrb.mxu3 %v1839_v61 }
0x10ab   :  { %v1625_v54 = vmul.f32 %v2192_v43, %v1624_v2  ;;  %v1837_v2 = vld [vmem:[#allocation13 + $0x20] sm:$0xff] }
0x10ac   :  { %1863 = vmatpush.msrb.mxu3 %v1837_v2 }
0x10ad   :  { %v1629_v55 = vsel %vm1628_vm14, %v2192_v43, %v1625_v54 }
0x10ae   :  { %v1631_v56 = vmul.f32 %v1629_v55, %v1597_v25 }
0x10b0   :  { %v1636_v57 = vmul.f32 %v2101_v41, %v1631_v56  ;;  %v1835_v56 = vld [vmem:[#allocation13 + $0x10] sm:$0xff] }
0x10b1   :  { %1864 = vmatpush.msrb.mxu3 %v1835_v56 }
0x10b2   :  { %v1641_v58 = vadd.f32 %v2102_v45, %v1636_v57 }
0x10b4   :  { %2006 = vmatmul.msk.f32.gmra.mxu2 %vm171_vm0, %v1641_v58 }
0x112b   :  { %v1675_v8 = vpop.f32.mrf.mxu2 }
0x112c   :  { %v1676_v9 = vadd.f32 %v2103_v7, %v1675_v8 }
0x112e   :  { %v1681_v11 = vmul.f32 %v1676_v9, %v1676_v9 }
0x1130   :  { %v1683_v12 = vmul.f32 %v1681_v11, %v1676_v9 }
0x1132   :  { %v1685_v13 = vmul.f32 0.044715, %v1683_v12 }
0x1134   :  { %v1687_v14 = vadd.f32 %v1685_v13, %v1676_v9  ;;  %v1805_v13 = vand.u32 127, %v1802_v3 }
0x1136   :  { %v1689_v15 = vmul.f32 0.7978846, %v1687_v14 }
0x1137   :  { %v1678_v16 = vpop.f32.mrf.mxu2 }
0x1138   :  { %2193 = vtanh.f32 %v1689_v15  ;;  %v1679_v17 = vadd.f32 %v2103_v7, %v1678_v16  ;;  %v1803_v7 = vshrl.u32 %v1802_v3, 7 }
0x113a   :  { %v1682_v44 = vmul.f32 %v1679_v17, %v1679_v17  ;;  %v1806_v14 = vmul.u32 8, %v1803_v7 }
0x113c   :  { %v1684_v18 = vmul.f32 %v1682_v44, %v1679_v17  ;;  %vm1807_vm6 = vcmp.eq.s32.totalorder %v1805_v13, %v1806_v14 }
0x113e   :  { %v2194_v19 = vpop.eup %2193  ;;  %v1686_v20 = vmul.f32 0.044715, %v1684_v18 }
0x113f   :  { %v1693_v21 = vadd.f32 1.0, %v2194_v19 }
0x1140   :  { %v1688_v22 = vadd.f32 %v1686_v20, %v1679_v17  ;;  %v2429_v20 = vmov 0.0  }
0x1141   :  { %v1695_v34 = vmul.f32 0.5, %v1693_v21  ;;  %v2019_v21 = vsel %vm1807_vm6, 1.0, %v2429_v20 }
0x1142   :  { %v1690_v23 = vmul.f32 0.7978846, %v1688_v22  ;;  %v1840_v22 = vld [vmem:[#allocation13 + $0x38] sm:$0xff] }
0x1143   :  { %v1697_v24 = vmul.f32 %v1695_v34, %v1676_v9  ;;  %v2105_v9 = vld [vmem:[#allocation11 + $0x1] ss:$0 sm:$0xff]  ;;  %v1838_v34 = vld [vmem:[#allocation13 + $0x28] sm:$0xff] }
0x1144   :  { %2195 = vtanh.f32 %v1690_v23  ;;  %v1836_v23 = vld [vmem:[#allocation13 + $0x18] sm:$0xff] }
0x1145   :  { %2016 = vmatmul.msk.f32.vlgmr.msrb.gmra.mxu0 %vm925_vm1, %v1697_v24  ;;  %v1833_v24 = vld [vmem:[#allocation13] sm:$0xff] }
0x1146   :  { %1865 = vmatpush.msrb.mxu3 %v1833_v24 }
0x114a   :  { %v2196_v48 = vpop.eup %2195 }
0x114b   :  { %v1694_v25 = vadd.f32 1.0, %v2196_v48  ;;  %v1834_v48 = vld [vmem:[#allocation13 + $0x8] sm:$0xff] }
0x114d   :  { %v1696_v26 = vmul.f32 0.5, %v1694_v25 }
0x114f   :  { %v1698_v27 = vmul.f32 %v1696_v26, %v1679_v17  ;;  %v2106_v17 = vld [vmem:[%s2994_s15 + $0x1] ss:$0 sm:$0xff] }
0x1150   :  { %v1841_v26 = vld [vmem:[%s3009_s17] sm:$0x3] }
0x1151   :  { %2017 = vmatmul.msk.f32.gmra.mxu0 %vm925_vm1, %v1698_v27  ;;  %v1844_v27 = vperm.slane %v1841_v26, 1 }
0x11c2   :  { %v1736_v28 = vpop.f32.mrf.mxu0 }
0x11c3   :  { %v1737_v53 = vadd.f32 %v2104_v38, %v1736_v28 }
0x11c5   :  { %v1742_v29 = vadd.f32 %v1737_v53, %v1640_v51  ;;  %v1843_v53 = vperm.slane %v1841_v26, 0 }
0x11c7   :  { %v1748_v30 = vsel %vm171_vm0, %v1742_v29, 0.0 }
0x11c8   :  { %1749 = vadd.xlane.f32.xlu0 %v1748_v30 }
0x11ce   :  { %v1739_v31 = vpop.f32.mrf.mxu0 }
0x11cf   :  { %v1740_v32 = vadd.f32 %v2104_v38, %v1739_v31 }
0x11d1   :  { %v1743_v33 = vadd.f32 %v1740_v32, %v1641_v58 }
0x11d3   :  { %v1751_v60 = vsel %vm171_vm0, %v1743_v33, 0.0 }
0x11d4   :  { %1752 = vadd.xlane.f32.xlu2 %v1751_v60 }
0x123b   :  { %v1750_v35 = vpop.xlane.xlu0 %1749 }
0x123c   :  { %v1754_v36 = vmul.f32 %v1750_v35, %v2554_v10 }
0x123e   :  { %v1756_v37 = vsub.f32 %v1742_v29, %v1754_v36 }
0x1240   :  { %v1758_v39 = vmul.f32 %v1756_v37, %v1756_v37 }
0x1242   :  { %v1760_v40 = vsel %vm171_vm0, %v1758_v39, 0.0 }
0x1243   :  { %1761 = vadd.xlane.f32.xlu1 %v1760_v40 }
0x1247   :  { %v1753_v62 = vpop.xlane.xlu2 %1752 }
0x1248   :  { %v1755_v47 = vmul.f32 %v1753_v62, %v2554_v10 }
0x124a   :  { %v1757_v41 = vsub.f32 %v1743_v33, %v1755_v47 }
0x124c   :  { %v1759_v42 = vmul.f32 %v1757_v41, %v1757_v41 }
0x124e   :  { %v1763_v43 = vsel %vm171_vm0, %v1759_v42, 0.0 }
0x124f   :  { %1764 = vadd.xlane.f32.xlu2 %v1763_v43 }
0x12b6   :  { %v1762_v52 = vpop.xlane.xlu1 %1761 }
0x12b7   :  { %v1766_v45 = vmul.f32 %v1762_v52, %v2554_v10 }
0x12b9   :  { %v1768_v46 = vadd.f32 1e-12, %v1766_v45 }
0x12bb   :  { %2197 = vrsqrt.f32 %v1768_v46  ;;  %vm1776_vm1 = vweird.f32 %v1768_v46 }
0x12c1   :  { %v2198_v49 = vpop.eup %2197 }
0x12c2   :  { %v1771_v50 = vmul.f32 %v2198_v49, %v1768_v46  ;;  %v1765_v51 = vpop.xlane.xlu2 %1764  ;;  %vm1777_vm15 = vweird.f32 %v2198_v49 }
0x12c3   :  { %v1767_v54 = vmul.f32 %v1765_v51, %v2554_v10  ;;  %vm1778_vm2 = vmor %vm1776_vm1, %vm1777_vm15 }
0x12c4   :  { %v1772_v55 = vmul.f32 %v2198_v49, %v1771_v50 }
0x12c5   :  { %v1769_v57 = vadd.f32 1e-12, %v1767_v54 }
0x12c6   :  { %v1773_v58 = vmul.f32 0.5, %v1772_v55 }
0x12c7   :  { %2199 = vrsqrt.f32 %v1769_v57  ;;  %vm1786_vm4 = vweird.f32 %v1769_v57 }
0x12c8   :  { %v1774_v59 = vsub.f32 1.5, %v1773_v58 }
0x12ca   :  { %v1775_v0 = vmul.f32 %v2198_v49, %v1774_v59 }
0x12cc   :  { %v1779_v5 = vsel %vm1778_vm2, %v2198_v49, %v1775_v0 }
0x12cd   :  { %v2200_v63 = vpop.eup %2199  ;;  %v1790_v11 = vmul.f32 %v1779_v5, %v1756_v37 }
0x12ce   :  { %v1781_v6 = vmul.f32 %v2200_v63, %v1769_v57  ;;  %vm1787_vm3 = vweird.f32 %v2200_v63 }
0x12cf   :  { %vm1788_vm5 = vmor %vm1786_vm4, %vm1787_vm3  ;;  %v1795_v44 = vmul.f32 %v2105_v9, %v1790_v11 }
0x12d0   :  { %v1782_v1 = vmul.f32 %v2200_v63, %v1781_v6 }
0x12d1   :  { %v1800_v19 = vadd.f32 %v2106_v17, %v1795_v44 }
0x12d2   :  { %v1783_v4 = vmul.f32 0.5, %v1782_v1 }
0x12d4   :  { %v1784_v10 = vsub.f32 1.5, %v1783_v4 }
0x12d6   :  { %v1785_v8 = vmul.f32 %v2200_v63, %v1784_v10 }
0x12d8   :  { %v1789_v12 = vsel %vm1788_vm5, %v2200_v63, %v1785_v8 }
0x12d9   :  { %v1791_v15 = vmul.f32 %v1789_v12, %v1757_v41 }
0x12db   :  { %v1796_v16 = vmul.f32 %v2105_v9, %v1791_v15 }
0x12dd   :  { %v1801_v18 = vadd.f32 %v2106_v17, %v1796_v16 }
0x12df   :  { %1827 = vmatpush.msrb.mxu1 %v1801_v18 }
0x12e1   :  { %1828 = vmatpush.msrb.mxu1 %v1800_v19 }
0x12e2   :  { %2020 = vmatmul.msk.f32.vlgmr.msrb.gmra.mxu1 %vm316_vm9, %v2019_v21  ;;  %vm1893_vm9 = vcmask 1041408  }
0x12e3   :  { %1882 = vmatpush.msra.mxu1 %v1840_v22 }
0x12e5   :  { %1883 = vmatpush.msra.mxu1 %v1838_v34 }
0x12e7   :  { %1884 = vmatpush.msra.mxu1 %v1836_v23 }
0x12e9   :  { %1885 = vmatpush.msra.mxu1 %v1834_v48 }
0x135f   :  { %v1830_v25 = vpop.f32.mrf.mxu1 }
0x1360   :  { %2021 = vmatmul.msk.f32.vlgmr.msrb.gmra.mxu3 %vm171_vm0, %v1830_v25  ;;  %2022 = vmatmul.msk.f32.vlgmr.msra.gmra.mxu1 %vm171_vm0, %v1830_v25 }
0x13dd   :  { %v1887_v38 = vpop.f32.mrf.mxu1 }
0x13de   :  { %v1888_v28 = vadd.f32 %v1887_v38, %v1844_v27 }
0x13e0   :  { %v1892_v30 = vrot.slane %v1888_v28, 6 }
0x13e3   :  { %v1867_v29 = vpop.f32.mrf.mxu3 }
0x13e4   :  { %v1868_v31 = vadd.f32 %v1867_v29, %v1843_v53 }
0x13e6   :  { %v1894_v32 = vsel %vm1893_vm9, %v1868_v31, %v1892_v30 }
0x13e7   :  { %1896 = vst [vmem:[#allocation14] sm:$0xf] %v1894_v32 }
0x13e8   :  { %1907 = dma.vmem_to_hbm [thread:$0]  %s1903_s3, 64, %s1905_s23, [#allocation4]  }
0x13e9   :  { %2403 = dma.done.wait [#allocation4], 64  }
0x13ea   :  { %2404 = vsyncadd [#allocation4], 4294967232 }
0x13eb   :  { %1912 = vsyncpa [#allocation3], 1 }
0x13ec   :  { %1913 = vsyncpa [#allocation6], 1 }
0x13ed   :  { %1914 = vsyncpa [#allocation9], 1 }
0x13ee   :  { %1915 = vsyncpa [#allocation12], 1 }
0x13ef   :  { %1916 = vsyncpa [#allocation4], 1 }

</bundles_post_ra>
